<compile_context>
chip_gen: v7x
topology: tpu7x:2x2x1
jax: 0.10.0
libtpu: 0.0.40
codegen_flags: <defaults>
</compile_context>

<pallas_src>
import math

import jax
import jax.numpy as jnp
from jax.experimental import pallas as pl
from jax.experimental.pallas import tpu as pltpu

PAD_MAX = 4                    # largest conv halo (the 9-tap branch)
N_SHIFT = 2 * PAD_MAX + 1      # tap offsets -4..4
EPS = 1e-5                     # BatchNorm1d eps (PyTorch default)
_NEG_PAD = -3.0e38             # finite stand-in for the maxpool's -inf padding
                               # (representable in bf16 and f32; never NaN-producing)


# --------------------------------------------------------------------------- #
# In-kernel helpers (shared by the stats pass and the output pass)
# --------------------------------------------------------------------------- #
def _tile_valid(cmask_ref, n, tn, lp, lanes_e):
    """Column-validity mask (1, lanes_e) for the current batch tile.

    cmask carries the static within-sample pattern (real columns of a full tile);
    the "how many samples of this tile are real" part is reconstructed from
    program_id, so no per-tile mask array is shipped from HBM.
    Returns (valid_bool, n_valid_scalar)."""
    i = pl.program_id(0)
    n_valid = jnp.minimum(jnp.maximum(jnp.int32(n) - i * tn, 0), tn)
    col = jax.lax.broadcasted_iota(jnp.int32, (1, lanes_e), 1)
    valid = (cmask_ref[...] > 0.5) & (col < PAD_MAX + n_valid * lp)
    return valid, n_valid


def _fused_branches(x_ref, wred_ref, bred_ref, wtaps_ref, wpool_ref, bias_ref,
                    valid, lanes):
    """All five branch convolutions for one folded batch tile.

    Returns the raw (pre-activation, pre/post-BN depending on the weights passed)
    outputs, shape (c_total, lanes), f32."""
    p = PAD_MAX
    xw = x_ref[0]                                            # (cin, lanes_e), bf16

    # Fused 1x1 reduce convs: all four branches' reduce weights stacked along the
    # output-channel (sublane) axis -> one wide MXU matmul over the whole tile.
    r = jnp.dot(wred_ref[...], xw, preferred_element_type=jnp.float32) + bred_ref[...]
    # PyTorch zero-pads the *reduce output* for the k-tap convs -> zero the halo /
    # padding columns, then round to bf16 once (the MXU's default precision would
    # perform this conversion on the fly anyway).
    r = jnp.where(valid, r, 0.0).astype(jnp.bfloat16)

    # MaxPool1d(k=3, stride=1, pad=1) with -inf padding, straight off the x tile.
    neg = jnp.asarray(_NEG_PAD, dtype=xw.dtype)
    xm = jnp.where(valid, xw, neg)
    pooled = jnp.maximum(jnp.maximum(xm[:, p - 1:p - 1 + lanes],
                                     xm[:, p:p + lanes]),
                         xm[:, p + 1:p + 1 + lanes])

    # Accumulate-over-taps: one small MXU matmul per tap offset keeps only a single
    # lane-shifted slice of r live at a time (no 9-way concat / VMEM copies).
    y = jnp.dot(wpool_ref[...], pooled, preferred_element_type=jnp.float32)
    for idx in range(N_SHIFT):
        d = idx - p
        y = y + jnp.dot(wtaps_ref[idx], r[:, p + d:p + d + lanes],
                        preferred_element_type=jnp.float32)
    return y + bias_ref[...]


# --------------------------------------------------------------------------- #
# Pass A: fused convolutions -> per-tile BatchNorm partial sums (stats only)
# --------------------------------------------------------------------------- #
def _make_stats_kernel(n, tn, lp, length, lanes, lanes_e):
    def kernel(x_ref, cmask_ref, wred_ref, bred_ref, wtaps_ref, wpool_ref, bias_ref,
               s_ref, ss_ref):
        valid, n_valid = _tile_valid(cmask_ref, n, tn, lp, lanes_e)
        y = _fused_branches(x_ref, wred_ref, bred_ref, wtaps_ref, wpool_ref, bias_ref,
                            valid, lanes)
        # Mask halo / batch-padding columns out of the statistics.
        mc = cmask_ref[...][:, PAD_MAX:PAD_MAX + lanes]
        col_c = jax.lax.broadcasted_iota(jnp.int32, (1, lanes), 1)
        valid_c = (mc > 0.5) & (col_c < n_valid * lp)
        ym = jnp.where(valid_c, y, 0.0)
        s_ref[0] = jnp.sum(ym, axis=1, keepdims=True)
        ss_ref[0] = jnp.sum(ym * ym, axis=1, keepdims=True)
    return kernel


# --------------------------------------------------------------------------- #
# Pass B: recompute with BN-folded weights, ReLU, and in-VMEM unfold to (N, C, L)
# --------------------------------------------------------------------------- #
def _make_output_kernel(n, tn, lp, length, lanes, lanes_e):
    def kernel(x_ref, cmask_ref, wred_ref, bred_ref, wtaps_ref, wpool_ref, bias_ref,
               o_ref):
        valid, _ = _tile_valid(cmask_ref, n, tn, lp, lanes_e)
        y = jnp.maximum(
            _fused_branches(x_ref, wred_ref, bred_ref, wtaps_ref, wpool_ref, bias_ref,
                            valid, lanes), 0.0)
        # In-VMEM unfold: (c_total, tn*lp) -> per-sample (c_total, length) stores,
        # so the kernel's output already has the final (N, C, L) layout and no
        # XLA-side transpose / halo-slice pass over the output is needed.
        for s in range(tn):
            o_ref[s] = y[:, s * lp + PAD_MAX:s * lp + PAD_MAX + length]
    return kernel


# --------------------------------------------------------------------------- #
# Weight re-layout (tiny, host/XLA side)
# --------------------------------------------------------------------------- #
def _prep_weights(params, cin):
    branch_keys = (("3", 3), ("5", 5), ("7", 7), ("9", 9))
    wred = jnp.concatenate([params[nm]["wr"][:, :, 0] for nm, _ in branch_keys], axis=0)
    bred = jnp.concatenate([params[nm]["br"] for nm, _ in branch_keys])[:, None]
    crt = wred.shape[0]

    co_list = [params[nm]["wk"].shape[0] for nm, _ in branch_keys]
    c_total = sum(co_list) + params["pool"]["w"].shape[0]

    wtaps = jnp.zeros((N_SHIFT, c_total, crt), jnp.float32)
    b_all, g_all, be_all = [], [], []
    row = rcol = 0
    for nm, k in branch_keys:
        pbr = params[nm]
        wk = pbr["wk"]                                   # (Co, Cr, K)
        co, cr, _ = wk.shape
        pad = (k - 1) // 2
        for tap in range(k):
            wtaps = wtaps.at[tap - pad + PAD_MAX, row:row + co, rcol:rcol + cr].set(
                wk[:, :, tap])
        b_all.append(pbr["bk"]); g_all.append(pbr["g"]); be_all.append(pbr["b"])
        row += co; rcol += cr

    pp = params["pool"]
    wp = pp["w"][:, :, 0]                                 # (Cpool, Cin)
    wpool = jnp.zeros((c_total, cin), jnp.float32).at[row:row + wp.shape[0], :].set(wp)
    b_all.append(pp["b1"]); g_all.append(pp["g"]); be_all.append(pp["b"])

    bias = jnp.concatenate(b_all)[:, None]
    gamma = jnp.concatenate(g_all)[:, None]
    beta = jnp.concatenate(be_all)[:, None]
    return wred, bred, wtaps, wpool, bias, gamma, beta


# --------------------------------------------------------------------------- #
# Per-chip VMEM budget & batch-tile heuristic
# --------------------------------------------------------------------------- #
def _vmem_limit_bytes():
    # 48 MiB on v7x (64 MiB physical per core), ~96 MiB on v5e/v6e (128 MiB).
    try:
        cap = getattr(pltpu.get_tpu_info(), "vmem_capacity_bytes", None)
    except Exception:
        cap = None
    if not cap:
        cap = 64 * 1024 * 1024
    return int(min(cap * 3 // 4, 100 * 1024 * 1024))


def _choose_block_batch(n, lp, cin, crt, c_total, length, vmem_bytes):
    # Target ~1024 lanes per tile (measured ~86% of the HBM roofline), capped by a
    # crude per-sample VMEM footprint estimate and so that nt >= 2 when the batch
    # allows ("parallel" grid axis then shards across both v7x TensorCores).
    per_sample = 4 * lp * (cin + crt + 3 * c_total) + 8 * c_total * length
    cap_vmem = max(1, (vmem_bytes // 3) // per_sample)
    tn = max(1, min(max(1, 1024 // lp), cap_vmem, n))
    if n >= 2:
        tn = min(tn, pl.cdiv(n, 2))
    # 128-lane alignment (unmasked lane-dense stores/loads) when the extra batch
    # padding is cheap (at most doubles the tile).
    g = 128 // math.gcd(lp, 128)
    tn_aligned = ((tn + g - 1) // g) * g
    if tn_aligned <= 2 * tn and tn_aligned <= cap_vmem:
        tn = tn_aligned
    return tn


# --------------------------------------------------------------------------- #
# Forward wrapper
# --------------------------------------------------------------------------- #
def inception_forward(x, params, *, block_batch=None):
    n, cin, length = x.shape
    lp = length + 2 * PAD_MAX

    wred, bred, wtaps, wpool, bias, gamma, beta = _prep_weights(params, cin)
    crt = wred.shape[0]
    c_total = wtaps.shape[1]

    vmem_limit = _vmem_limit_bytes()
    if block_batch is None:
        block_batch = _choose_block_batch(n, lp, cin, crt, c_total, length, vmem_limit)
    tn = int(block_batch)
    nt = pl.cdiv(n, tn)
    n_pad = nt * tn
    lanes = tn * lp
    lanes_e = lanes + 2 * PAD_MAX

    # Fold `tn` samples into the lane axis (bf16: the MXU's default precision is a
    # single bf16 pass anyway, so this halves x bytes with no numeric change to the
    # matmuls).  PAD_MAX extra zero columns at both tile ends make every tap shift
    # a plain static slice in the kernel.
    x_p = jnp.pad(x, ((0, n_pad - n), (0, 0), (PAD_MAX, PAD_MAX)))
    x_t = x_p.reshape(nt, tn, cin, lp).transpose(0, 2, 1, 3).reshape(nt, cin, lanes)
    x_t = jnp.pad(x_t, ((0, 0), (0, 0), (PAD_MAX, PAD_MAX))).astype(jnp.bfloat16)

    # Static, tile-invariant column pattern (real columns of a fully-populated tile).
    pos = jnp.arange(lanes_e) - PAD_MAX
    in_sample = (pos % lp >= PAD_MAX) & (pos % lp < PAD_MAX + length)
    cmask = ((pos >= 0) & (pos < lanes) & in_sample).astype(jnp.float32)[None, :]

    wred_b = wred.astype(jnp.bfloat16)

    cparams = pltpu.CompilerParams(dimension_semantics=("parallel",),
                                   vmem_limit_bytes=vmem_limit)

    in_specs = [
        pl.BlockSpec((1, cin, lanes_e), lambda i: (i, 0, 0)),
        pl.BlockSpec((1, lanes_e), lambda i: (0, 0)),
        pl.BlockSpec((crt, cin), lambda i: (0, 0)),
        pl.BlockSpec((crt, 1), lambda i: (0, 0)),
        pl.BlockSpec((N_SHIFT, c_total, crt), lambda i: (0, 0, 0)),
        pl.BlockSpec((c_total, cin), lambda i: (0, 0)),
        pl.BlockSpec((c_total, 1), lambda i: (0, 0)),
    ]

    # ----- pass A: fused convolutions -> per-tile BN partial sums (stats only) -----
    s_part, ss_part = pl.pallas_call(
        _make_stats_kernel(n, tn, lp, length, lanes, lanes_e),
        grid=(nt,),
        in_specs=in_specs,
        out_specs=(pl.BlockSpec((1, c_total, 1), lambda i: (i, 0, 0)),
                   pl.BlockSpec((1, c_total, 1), lambda i: (i, 0, 0))),
        out_shape=(jax.ShapeDtypeStruct((nt, c_total, 1), jnp.float32),
                   jax.ShapeDtypeStruct((nt, c_total, 1), jnp.float32)),
        compiler_params=cparams,
    )(x_t, cmask, wred_b, bred, wtaps.astype(jnp.bfloat16),
      wpool.astype(jnp.bfloat16), bias)

    # ----- BatchNorm batch statistics (training mode: biased variance over (N, L)),
    # then fold the affine BN into the branch weights (tiny (C,1) math in XLA). -----
    cnt = jnp.float32(n * length)
    mean = jnp.sum(s_part, axis=0) / cnt
    var = jnp.maximum(jnp.sum(ss_part, axis=0) / cnt - mean * mean, 0.0)
    scale = gamma * jax.lax.rsqrt(var + EPS)
    shift = beta - mean * scale
    wtaps_f = (wtaps * scale[None]).astype(jnp.bfloat16)
    wpool_f = (wpool * scale).astype(jnp.bfloat16)
    bias_f = bias * scale + shift

    # ----- pass B: recompute with folded weights, ReLU, unfold in-VMEM -----
    out_full = pl.pallas_call(
        _make_output_kernel(n, tn, lp, length, lanes, lanes_e),
        grid=(nt,),
        in_specs=in_specs,
        out_specs=pl.BlockSpec((tn, c_total, length), lambda i: (i, 0, 0)),
        out_shape=jax.ShapeDtypeStruct((n_pad, c_total, length), jnp.float32),
        compiler_params=cparams,
    )(x_t, cmask, wred_b, bred, wtaps_f, wpool_f, bias_f)

    return out_full if n_pad == n else out_full[:n]


# --------------------------------------------------------------------------- #
# Deterministic parameter init (shapes follow the PyTorch __init__)
# --------------------------------------------------------------------------- #
def init_params(key, in_channels, reduce_3x3, out_3x3, reduce_5x5, out_5x5,
                reduce_7x7, out_7x7, reduce_9x9, out_9x9, out_pool):
    keys = iter(jax.random.split(key, 32))

    def conv_w(cout, cin, k):
        return 0.1 * jax.random.normal(next(keys), (cout, cin, k), jnp.float32)

    def vec(c):
        return 0.1 * jax.random.normal(next(keys), (c,), jnp.float32)

    params = {}
    for name, cr, co, k in (("3", reduce_3x3, out_3x3, 3), ("5", reduce_5x5, out_5x5, 5),
                            ("7", reduce_7x7, out_7x7, 7), ("9", reduce_9x9, out_9x9, 9)):
        params[name] = dict(wr=conv_w(cr, in_channels, 1), br=vec(cr),
                            wk=conv_w(co, cr, k), bk=vec(co),
                            g=1.0 + vec(co), b=vec(co))
    params["pool"] = dict(w=conv_w(out_pool, in_channels, 1), b1=vec(out_pool),
                          g=1.0 + vec(out_pool), b=vec(out_pool))
    return params


# --------------------------------------------------------------------------- #
# Pure-JAX reference (correctness check only; full-precision convs)
# --------------------------------------------------------------------------- #
def reference_forward(x, params):
    def conv1d(x, w, b, pad):
        out = jax.lax.conv_general_dilated(
            x, w, window_strides=(1,), padding=[(pad, pad)],
            dimension_numbers=("NCH", "OIH", "NCH"),
            precision=jax.lax.Precision.HIGHEST)
        return out + b[None, :, None]

    def bn_relu(y, g, b):
        mean = jnp.mean(y, axis=(0, 2), keepdims=True)
        var = jnp.mean((y - mean) ** 2, axis=(0, 2), keepdims=True)
        return jnp.maximum((y - mean) / jnp.sqrt(var + EPS) * g[None, :, None]
                           + b[None, :, None], 0.0)

    outs = []
    for name, k in (("3", 3), ("5", 5), ("7", 7), ("9", 9)):
        p = params[name]
        r = conv1d(x, p["wr"], p["br"], 0)
        y = conv1d(r, p["wk"], p["bk"], (k - 1) // 2)
        outs.append(bn_relu(y, p["g"], p["b"]))
    pooled = jax.lax.reduce_window(x, -jnp.inf, jax.lax.max,
                                   (1, 1, 3), (1, 1, 1),
                                   [(0, 0), (0, 0), (1, 1)])
    pp = params["pool"]
    y = conv1d(pooled, pp["w"], pp["b1"], 0)
    outs.append(bn_relu(y, pp["g"], pp["b"]))
    return jnp.concatenate(outs, axis=1)


if __name__ == "__main__":
    key = jax.random.PRNGKey(0)
    kx, kp = jax.random.split(key)

    N, Cin, L = 4, 8, 16
    x = jax.random.normal(kx, (N, Cin, L), jnp.float32)
    params = init_params(kp, Cin,
                         4, 8,   # reduce_3x3, out_3x3
                         4, 8,   # reduce_5x5, out_5x5
                         4, 8,   # reduce_7x7, out_7x7
                         4, 8,   # reduce_9x9, out_9x9
                         8)      # out_pool

    fwd = jax.jit(lambda xx: inception_forward(xx, params))
    out = jax.block_until_ready(fwd(x))

    ref = reference_forward(x, params)
    assert out.shape == ref.shape == (N, 40, L)
    # Kernel matmuls run at the MXU's default precision (single bf16 pass, f32
    # accumulate) and the BN scale is folded into bf16 weights; the reference runs
    # the convs at HIGHEST precision, so allow a small tolerance.
    err = float(jnp.max(jnp.abs(out - ref)))
    if not bool(jnp.allclose(out, ref, atol=4e-2, rtol=4e-2)):
        raise AssertionError(f"mismatch vs reference, max abs err = {err}")
    print("KERNEL_OK")
</pallas_src>

<mosaic_0001>
module attributes {stable_mosaic.version = 11 : i64} {
  func.func @kernel(%arg0: i32, %arg1: memref<1x8x56xbf16, #tpu.memory_space<vmem>>, %arg2: memref<1x56xf32, #tpu.memory_space<vmem>>, %arg3: memref<16x8xbf16, #tpu.memory_space<vmem>>, %arg4: memref<16x1xf32, #tpu.memory_space<vmem>>, %arg5: memref<9x40x16xbf16, #tpu.memory_space<vmem>>, %arg6: memref<40x8xbf16, #tpu.memory_space<vmem>>, %arg7: memref<40x1xf32, #tpu.memory_space<vmem>>, %arg8: memref<1x40x1xf32, #tpu.memory_space<vmem>>, %arg9: memref<1x40x1xf32, #tpu.memory_space<vmem>>) attributes {dimension_semantics = [#tpu.dimension_semantics<parallel>], iteration_bounds = array<i64: 2>, scalar_prefetch = 0 : i64, scratch_operands = 0 : i64, tpu.core_type = #tpu.core_type<tc>, window_params = [{transform_indices = @transform_0, window_bounds = array<i64: 1, 8, 56>}, {pipeline_mode = #tpu.pipeline_mode<synchronous>, transform_indices = @transform_1, window_bounds = array<i64: 1, 56>}, {pipeline_mode = #tpu.pipeline_mode<synchronous>, transform_indices = @transform_2, window_bounds = array<i64: 16, 8>}, {pipeline_mode = #tpu.pipeline_mode<synchronous>, transform_indices = @transform_3, window_bounds = array<i64: 16, 1>}, {pipeline_mode = #tpu.pipeline_mode<synchronous>, transform_indices = @transform_4, window_bounds = array<i64: 9, 40, 16>}, {pipeline_mode = #tpu.pipeline_mode<synchronous>, transform_indices = @transform_5, window_bounds = array<i64: 40, 8>}, {pipeline_mode = #tpu.pipeline_mode<synchronous>, transform_indices = @transform_6, window_bounds = array<i64: 40, 1>}, {transform_indices = @transform_7, window_bounds = array<i64: 1, 40, 1>}, {transform_indices = @transform_8, window_bounds = array<i64: 1, 40, 1>}]} {
    %c2_i32 = arith.constant 2 : i32
    %0 = arith.muli %arg0, %c2_i32 : i32
    %c4_i32 = arith.constant 4 : i32
    %1 = arith.subi %c4_i32, %0 : i32
    %c0_i32 = arith.constant 0 : i32
    %2 = arith.maxsi %1, %c0_i32 : i32
    %c2_i32_0 = arith.constant 2 : i32
    %3 = arith.minsi %2, %c2_i32_0 : i32
    %4 = tpu.iota {dimensions = array<i32: 1>} : vector<1x56xi32>
    %c0 = arith.constant 0 : index
    %c0_1 = arith.constant 0 : index
    %5 = vector.load %arg2[%c0, %c0_1] : memref<1x56xf32, #tpu.memory_space<vmem>>, vector<1x56xf32>
    %cst = arith.constant 5.000000e-01 : f32
    %6 = vector.broadcast %cst : f32 to vector<1x56xf32>
    %7 = arith.cmpf ogt, %5, %6 : vector<1x56xf32>
    %c24_i32 = arith.constant 24 : i32
    %8 = arith.muli %3, %c24_i32 : i32
    %c4_i32_2 = arith.constant 4 : i32
    %9 = arith.addi %c4_i32_2, %8 : i32
    %10 = vector.broadcast %9 : i32 to vector<1x56xi32>
    %11 = arith.cmpi slt, %4, %10 : vector<1x56xi32>
    %12 = arith.andi %7, %11 : vector<1x56xi1>
    %c0_3 = arith.constant 0 : index
    %c0_4 = arith.constant 0 : index
    %c0_5 = arith.constant 0 : index
    %13 = vector.load %arg1[%c0_3, %c0_4, %c0_5] : memref<1x8x56xbf16, #tpu.memory_space<vmem>>, vector<1x8x56xbf16>
    %14 = vector.shape_cast %13 : vector<1x8x56xbf16> to vector<8x56xbf16>
    %c0_6 = arith.constant 0 : index
    %c0_7 = arith.constant 0 : index
    %15 = vector.load %arg3[%c0_6, %c0_7] : memref<16x8xbf16, #tpu.memory_space<vmem>>, vector<16x8xbf16>
    %cst_8 = arith.constant dense<0.000000e+00> : vector<16x56xf32>
    %16 = tpu.matmul %15, %14, %cst_8 {dimension_numbers = #tpu.dot_dimension_numbers<[1], [0], [0], [1], [0, 0, 1, 1], [], []>} : vector<16x8xbf16>, vector<8x56xbf16>, vector<16x56xf32> -> vector<16x56xf32>
    %c0_9 = arith.constant 0 : index
    %c0_10 = arith.constant 0 : index
    %17 = vector.load %arg4[%c0_9, %c0_10] : memref<16x1xf32, #tpu.memory_space<vmem>>, vector<16x1xf32>
    %18 = vector.broadcast %17 : vector<16x1xf32> to vector<16x56xf32>
    %19 = arith.addf %16, %18 : vector<16x56xf32>
    %cst_11 = arith.constant 0.000000e+00 : f32
    %20 = vector.shape_cast %12 : vector<1x56xi1> to vector<1x56xi1>
    %21 = vector.broadcast %20 : vector<1x56xi1> to vector<16x56xi1>
    %22 = vector.broadcast %cst_11 : f32 to vector<16x56xf32>
    %23 = arith.select %21, %19, %22 : vector<16x56xi1>, vector<16x56xf32>
    %24 = arith.truncf %23 : vector<16x56xf32> to vector<16x56xbf16>
    %cst_12 = arith.constant -3.004060e+38 : bf16
    %25 = vector.shape_cast %12 : vector<1x56xi1> to vector<1x56xi1>
    %26 = vector.broadcast %25 : vector<1x56xi1> to vector<8x56xi1>
    %27 = vector.broadcast %cst_12 : bf16 to vector<8x56xbf16>
    %28 = arith.select %26, %14, %27 : vector<8x56xi1>, vector<8x56xbf16>
    %29 = vector.extract_strided_slice %28 {offsets = [0, 3], sizes = [8, 48], strides = [1, 1]} : vector<8x56xbf16> to vector<8x48xbf16>
    %30 = vector.extract_strided_slice %28 {offsets = [0, 4], sizes = [8, 48], strides = [1, 1]} : vector<8x56xbf16> to vector<8x48xbf16>
    %31 = arith.maximumf %29, %30 : vector<8x48xbf16>
    %32 = vector.extract_strided_slice %28 {offsets = [0, 5], sizes = [8, 48], strides = [1, 1]} : vector<8x56xbf16> to vector<8x48xbf16>
    %33 = arith.maximumf %31, %32 : vector<8x48xbf16>
    %c0_13 = arith.constant 0 : index
    %c0_14 = arith.constant 0 : index
    %34 = vector.load %arg6[%c0_13, %c0_14] : memref<40x8xbf16, #tpu.memory_space<vmem>>, vector<40x8xbf16>
    %cst_15 = arith.constant dense<0.000000e+00> : vector<40x48xf32>
    %35 = tpu.matmul %34, %33, %cst_15 {dimension_numbers = #tpu.dot_dimension_numbers<[1], [0], [0], [1], [0, 0, 1, 1], [], []>} : vector<40x8xbf16>, vector<8x48xbf16>, vector<40x48xf32> -> vector<40x48xf32>
    %c0_16 = arith.constant 0 : index
    %c0_17 = arith.constant 0 : index
    %c0_18 = arith.constant 0 : index
    %36 = vector.load %arg5[%c0_16, %c0_17, %c0_18] : memref<9x40x16xbf16, #tpu.memory_space<vmem>>, vector<1x40x16xbf16>
    %37 = vector.shape_cast %36 : vector<1x40x16xbf16> to vector<40x16xbf16>
    %38 = vector.extract_strided_slice %24 {offsets = [0, 0], sizes = [16, 48], strides = [1, 1]} : vector<16x56xbf16> to vector<16x48xbf16>
    %cst_19 = arith.constant dense<0.000000e+00> : vector<40x48xf32>
    %39 = tpu.matmul %37, %38, %cst_19 {dimension_numbers = #tpu.dot_dimension_numbers<[1], [0], [0], [1], [0, 0, 1, 1], [], []>} : vector<40x16xbf16>, vector<16x48xbf16>, vector<40x48xf32> -> vector<40x48xf32>
    %40 = arith.addf %35, %39 : vector<40x48xf32>
    %c1 = arith.constant 1 : index
    %c0_20 = arith.constant 0 : index
    %c0_21 = arith.constant 0 : index
    %41 = vector.load %arg5[%c1, %c0_20, %c0_21] : memref<9x40x16xbf16, #tpu.memory_space<vmem>>, vector<1x40x16xbf16>
    %42 = vector.shape_cast %41 : vector<1x40x16xbf16> to vector<40x16xbf16>
    %43 = vector.extract_strided_slice %24 {offsets = [0, 1], sizes = [16, 48], strides = [1, 1]} : vector<16x56xbf16> to vector<16x48xbf16>
    %cst_22 = arith.constant dense<0.000000e+00> : vector<40x48xf32>
    %44 = tpu.matmul %42, %43, %cst_22 {dimension_numbers = #tpu.dot_dimension_numbers<[1], [0], [0], [1], [0, 0, 1, 1], [], []>} : vector<40x16xbf16>, vector<16x48xbf16>, vector<40x48xf32> -> vector<40x48xf32>
    %45 = arith.addf %40, %44 : vector<40x48xf32>
    %c2 = arith.constant 2 : index
    %c0_23 = arith.constant 0 : index
    %c0_24 = arith.constant 0 : index
    %46 = vector.load %arg5[%c2, %c0_23, %c0_24] : memref<9x40x16xbf16, #tpu.memory_space<vmem>>, vector<1x40x16xbf16>
    %47 = vector.shape_cast %46 : vector<1x40x16xbf16> to vector<40x16xbf16>
    %48 = vector.extract_strided_slice %24 {offsets = [0, 2], sizes = [16, 48], strides = [1, 1]} : vector<16x56xbf16> to vector<16x48xbf16>
    %cst_25 = arith.constant dense<0.000000e+00> : vector<40x48xf32>
    %49 = tpu.matmul %47, %48, %cst_25 {dimension_numbers = #tpu.dot_dimension_numbers<[1], [0], [0], [1], [0, 0, 1, 1], [], []>} : vector<40x16xbf16>, vector<16x48xbf16>, vector<40x48xf32> -> vector<40x48xf32>
    %50 = arith.addf %45, %49 : vector<40x48xf32>
    %c3 = arith.constant 3 : index
    %c0_26 = arith.constant 0 : index
    %c0_27 = arith.constant 0 : index
    %51 = vector.load %arg5[%c3, %c0_26, %c0_27] : memref<9x40x16xbf16, #tpu.memory_space<vmem>>, vector<1x40x16xbf16>
    %52 = vector.shape_cast %51 : vector<1x40x16xbf16> to vector<40x16xbf16>
    %53 = vector.extract_strided_slice %24 {offsets = [0, 3], sizes = [16, 48], strides = [1, 1]} : vector<16x56xbf16> to vector<16x48xbf16>
    %cst_28 = arith.constant dense<0.000000e+00> : vector<40x48xf32>
    %54 = tpu.matmul %52, %53, %cst_28 {dimension_numbers = #tpu.dot_dimension_numbers<[1], [0], [0], [1], [0, 0, 1, 1], [], []>} : vector<40x16xbf16>, vector<16x48xbf16>, vector<40x48xf32> -> vector<40x48xf32>
    %55 = arith.addf %50, %54 : vector<40x48xf32>
    %c4 = arith.constant 4 : index
    %c0_29 = arith.constant 0 : index
    %c0_30 = arith.constant 0 : index
    %56 = vector.load %arg5[%c4, %c0_29, %c0_30] : memref<9x40x16xbf16, #tpu.memory_space<vmem>>, vector<1x40x16xbf16>
    %57 = vector.shape_cast %56 : vector<1x40x16xbf16> to vector<40x16xbf16>
    %58 = vector.extract_strided_slice %24 {offsets = [0, 4], sizes = [16, 48], strides = [1, 1]} : vector<16x56xbf16> to vector<16x48xbf16>
    %cst_31 = arith.constant dense<0.000000e+00> : vector<40x48xf32>
    %59 = tpu.matmul %57, %58, %cst_31 {dimension_numbers = #tpu.dot_dimension_numbers<[1], [0], [0], [1], [0, 0, 1, 1], [], []>} : vector<40x16xbf16>, vector<16x48xbf16>, vector<40x48xf32> -> vector<40x48xf32>
    %60 = arith.addf %55, %59 : vector<40x48xf32>
    %c5 = arith.constant 5 : index
    %c0_32 = arith.constant 0 : index
    %c0_33 = arith.constant 0 : index
    %61 = vector.load %arg5[%c5, %c0_32, %c0_33] : memref<9x40x16xbf16, #tpu.memory_space<vmem>>, vector<1x40x16xbf16>
    %62 = vector.shape_cast %61 : vector<1x40x16xbf16> to vector<40x16xbf16>
    %63 = vector.extract_strided_slice %24 {offsets = [0, 5], sizes = [16, 48], strides = [1, 1]} : vector<16x56xbf16> to vector<16x48xbf16>
    %cst_34 = arith.constant dense<0.000000e+00> : vector<40x48xf32>
    %64 = tpu.matmul %62, %63, %cst_34 {dimension_numbers = #tpu.dot_dimension_numbers<[1], [0], [0], [1], [0, 0, 1, 1], [], []>} : vector<40x16xbf16>, vector<16x48xbf16>, vector<40x48xf32> -> vector<40x48xf32>
    %65 = arith.addf %60, %64 : vector<40x48xf32>
    %c6 = arith.constant 6 : index
    %c0_35 = arith.constant 0 : index
    %c0_36 = arith.constant 0 : index
    %66 = vector.load %arg5[%c6, %c0_35, %c0_36] : memref<9x40x16xbf16, #tpu.memory_space<vmem>>, vector<1x40x16xbf16>
    %67 = vector.shape_cast %66 : vector<1x40x16xbf16> to vector<40x16xbf16>
    %68 = vector.extract_strided_slice %24 {offsets = [0, 6], sizes = [16, 48], strides = [1, 1]} : vector<16x56xbf16> to vector<16x48xbf16>
    %cst_37 = arith.constant dense<0.000000e+00> : vector<40x48xf32>
    %69 = tpu.matmul %67, %68, %cst_37 {dimension_numbers = #tpu.dot_dimension_numbers<[1], [0], [0], [1], [0, 0, 1, 1], [], []>} : vector<40x16xbf16>, vector<16x48xbf16>, vector<40x48xf32> -> vector<40x48xf32>
    %70 = arith.addf %65, %69 : vector<40x48xf32>
    %c7 = arith.constant 7 : index
    %c0_38 = arith.constant 0 : index
    %c0_39 = arith.constant 0 : index
    %71 = vector.load %arg5[%c7, %c0_38, %c0_39] : memref<9x40x16xbf16, #tpu.memory_space<vmem>>, vector<1x40x16xbf16>
    %72 = vector.shape_cast %71 : vector<1x40x16xbf16> to vector<40x16xbf16>
    %73 = vector.extract_strided_slice %24 {offsets = [0, 7], sizes = [16, 48], strides = [1, 1]} : vector<16x56xbf16> to vector<16x48xbf16>
    %cst_40 = arith.constant dense<0.000000e+00> : vector<40x48xf32>
    %74 = tpu.matmul %72, %73, %cst_40 {dimension_numbers = #tpu.dot_dimension_numbers<[1], [0], [0], [1], [0, 0, 1, 1], [], []>} : vector<40x16xbf16>, vector<16x48xbf16>, vector<40x48xf32> -> vector<40x48xf32>
    %75 = arith.addf %70, %74 : vector<40x48xf32>
    %c8 = arith.constant 8 : index
    %c0_41 = arith.constant 0 : index
    %c0_42 = arith.constant 0 : index
    %76 = vector.load %arg5[%c8, %c0_41, %c0_42] : memref<9x40x16xbf16, #tpu.memory_space<vmem>>, vector<1x40x16xbf16>
    %77 = vector.shape_cast %76 : vector<1x40x16xbf16> to vector<40x16xbf16>
    %78 = vector.extract_strided_slice %24 {offsets = [0, 8], sizes = [16, 48], strides = [1, 1]} : vector<16x56xbf16> to vector<16x48xbf16>
    %cst_43 = arith.constant dense<0.000000e+00> : vector<40x48xf32>
    %79 = tpu.matmul %77, %78, %cst_43 {dimension_numbers = #tpu.dot_dimension_numbers<[1], [0], [0], [1], [0, 0, 1, 1], [], []>} : vector<40x16xbf16>, vector<16x48xbf16>, vector<40x48xf32> -> vector<40x48xf32>
    %80 = arith.addf %75, %79 : vector<40x48xf32>
    %c0_44 = arith.constant 0 : index
    %c0_45 = arith.constant 0 : index
    %81 = vector.load %arg7[%c0_44, %c0_45] : memref<40x1xf32, #tpu.memory_space<vmem>>, vector<40x1xf32>
    %82 = vector.broadcast %81 : vector<40x1xf32> to vector<40x48xf32>
    %83 = arith.addf %80, %82 : vector<40x48xf32>
    %c0_46 = arith.constant 0 : index
    %c0_47 = arith.constant 0 : index
    %84 = vector.load %arg2[%c0_46, %c0_47] : memref<1x56xf32, #tpu.memory_space<vmem>>, vector<1x56xf32>
    %85 = vector.extract_strided_slice %84 {offsets = [0, 4], sizes = [1, 48], strides = [1, 1]} : vector<1x56xf32> to vector<1x48xf32>
    %86 = tpu.iota {dimensions = array<i32: 1>} : vector<1x48xi32>
    %cst_48 = arith.constant 5.000000e-01 : f32
    %87 = vector.broadcast %cst_48 : f32 to vector<1x48xf32>
    %88 = arith.cmpf ogt, %85, %87 : vector<1x48xf32>
    %c24_i32_49 = arith.constant 24 : i32
    %89 = arith.muli %3, %c24_i32_49 : i32
    %90 = vector.broadcast %89 : i32 to vector<1x48xi32>
    %91 = arith.cmpi slt, %86, %90 : vector<1x48xi32>
    %92 = arith.andi %88, %91 : vector<1x48xi1>
    %cst_50 = arith.constant 0.000000e+00 : f32
    %93 = vector.shape_cast %92 : vector<1x48xi1> to vector<1x48xi1>
    %94 = vector.broadcast %93 : vector<1x48xi1> to vector<40x48xi1>
    %95 = vector.broadcast %cst_50 : f32 to vector<40x48xf32>
    %96 = arith.select %94, %83, %95 : vector<40x48xi1>, vector<40x48xf32>
    %cst_51 = arith.constant dense<0.000000e+00> : vector<40xf32>
    %97 = vector.multi_reduction <add>, %96, %cst_51 [1] : vector<40x48xf32> to vector<40xf32>
    %98 = vector.shape_cast %97 : vector<40xf32> to vector<40x1xf32>
    %c0_52 = arith.constant 0 : index
    %c0_53 = arith.constant 0 : index
    %c0_54 = arith.constant 0 : index
    %99 = vector.load %arg8[%c0_52, %c0_53, %c0_54] : memref<1x40x1xf32, #tpu.memory_space<vmem>>, vector<1x40x1xf32>
    %100 = vector.shape_cast %99 : vector<1x40x1xf32> to vector<40x1xf32>
    %101 = vector.shape_cast %98 : vector<40x1xf32> to vector<1x40x1xf32>
    tpu.vector_store %arg8[%c0_52, %c0_53, %c0_54], %101 {strides = array<i32>} : memref<1x40x1xf32, #tpu.memory_space<vmem>>, vector<1x40x1xf32>,
    %102 = arith.mulf %96, %96 : vector<40x48xf32>
    %cst_55 = arith.constant dense<0.000000e+00> : vector<40xf32>
    %103 = vector.multi_reduction <add>, %102, %cst_55 [1] : vector<40x48xf32> to vector<40xf32>
    %104 = vector.shape_cast %103 : vector<40xf32> to vector<40x1xf32>
    %c0_56 = arith.constant 0 : index
    %c0_57 = arith.constant 0 : index
    %c0_58 = arith.constant 0 : index
    %105 = vector.load %arg9[%c0_56, %c0_57, %c0_58] : memref<1x40x1xf32, #tpu.memory_space<vmem>>, vector<1x40x1xf32>
    %106 = vector.shape_cast %105 : vector<1x40x1xf32> to vector<40x1xf32>
    %107 = vector.shape_cast %104 : vector<40x1xf32> to vector<1x40x1xf32>
    tpu.vector_store %arg9[%c0_56, %c0_57, %c0_58], %107 {strides = array<i32>} : memref<1x40x1xf32, #tpu.memory_space<vmem>>, vector<1x40x1xf32>,
    return
  }
  func.func @transform_0(%arg0: i32) -> (i32, i32, i32) {
    %c0_i32 = arith.constant 0 : i32
    %c0_i32_0 = arith.constant 0 : i32
    %c0_i32_1 = arith.constant 0 : i32
    return %arg0, %c0_i32, %c0_i32_0 : i32, i32, i32
  }
  func.func @transform_1(%arg0: i32) -> (i32, i32) {
    %c0_i32 = arith.constant 0 : i32
    %c0_i32_0 = arith.constant 0 : i32
    %c0_i32_1 = arith.constant 0 : i32
    return %c0_i32, %c0_i32_0 : i32, i32
  }
  func.func @transform_2(%arg0: i32) -> (i32, i32) {
    %c0_i32 = arith.constant 0 : i32
    %c0_i32_0 = arith.constant 0 : i32
    %c0_i32_1 = arith.constant 0 : i32
    return %c0_i32, %c0_i32_0 : i32, i32
  }
  func.func @transform_3(%arg0: i32) -> (i32, i32) {
    %c0_i32 = arith.constant 0 : i32
    %c0_i32_0 = arith.constant 0 : i32
    %c0_i32_1 = arith.constant 0 : i32
    return %c0_i32, %c0_i32_0 : i32, i32
  }
  func.func @transform_4(%arg0: i32) -> (i32, i32, i32) {
    %c0_i32 = arith.constant 0 : i32
    %c0_i32_0 = arith.constant 0 : i32
    %c0_i32_1 = arith.constant 0 : i32
    %c0_i32_2 = arith.constant 0 : i32
    return %c0_i32, %c0_i32_0, %c0_i32_1 : i32, i32, i32
  }
  func.func @transform_5(%arg0: i32) -> (i32, i32) {
    %c0_i32 = arith.constant 0 : i32
    %c0_i32_0 = arith.constant 0 : i32
    %c0_i32_1 = arith.constant 0 : i32
    return %c0_i32, %c0_i32_0 : i32, i32
  }
  func.func @transform_6(%arg0: i32) -> (i32, i32) {
    %c0_i32 = arith.constant 0 : i32
    %c0_i32_0 = arith.constant 0 : i32
    %c0_i32_1 = arith.constant 0 : i32
    return %c0_i32, %c0_i32_0 : i32, i32
  }
  func.func @transform_7(%arg0: i32) -> (i32, i32, i32) {
    %c0_i32 = arith.constant 0 : i32
    %c0_i32_0 = arith.constant 0 : i32
    %c0_i32_1 = arith.constant 0 : i32
    return %arg0, %c0_i32, %c0_i32_0 : i32, i32, i32
  }
  func.func @transform_8(%arg0: i32) -> (i32, i32, i32) {
    %c0_i32 = arith.constant 0 : i32
    %c0_i32_0 = arith.constant 0 : i32
    %c0_i32_1 = arith.constant 0 : i32
    return %arg0, %c0_i32, %c0_i32_0 : i32, i32, i32
  }
}

module attributes {stable_mosaic.version = 11 : i64} {
  func.func @kernel(%arg0: i32, %arg1: memref<1x8x56xbf16, #tpu.memory_space<vmem>>, %arg2: memref<1x56xf32, #tpu.memory_space<vmem>>, %arg3: memref<16x8xbf16, #tpu.memory_space<vmem>>, %arg4: memref<16x1xf32, #tpu.memory_space<vmem>>, %arg5: memref<9x40x16xbf16, #tpu.memory_space<vmem>>, %arg6: memref<40x8xbf16, #tpu.memory_space<vmem>>, %arg7: memref<40x1xf32, #tpu.memory_space<vmem>>, %arg8: memref<2x40x16xf32, #tpu.memory_space<vmem>>) attributes {dimension_semantics = [#tpu.dimension_semantics<parallel>], iteration_bounds = array<i64: 2>, scalar_prefetch = 0 : i64, scratch_operands = 0 : i64, tpu.core_type = #tpu.core_type<tc>, window_params = [{transform_indices = @transform_0, window_bounds = array<i64: 1, 8, 56>}, {pipeline_mode = #tpu.pipeline_mode<synchronous>, transform_indices = @transform_1, window_bounds = array<i64: 1, 56>}, {pipeline_mode = #tpu.pipeline_mode<synchronous>, transform_indices = @transform_2, window_bounds = array<i64: 16, 8>}, {pipeline_mode = #tpu.pipeline_mode<synchronous>, transform_indices = @transform_3, window_bounds = array<i64: 16, 1>}, {pipeline_mode = #tpu.pipeline_mode<synchronous>, transform_indices = @transform_4, window_bounds = array<i64: 9, 40, 16>}, {pipeline_mode = #tpu.pipeline_mode<synchronous>, transform_indices = @transform_5, window_bounds = array<i64: 40, 8>}, {pipeline_mode = #tpu.pipeline_mode<synchronous>, transform_indices = @transform_6, window_bounds = array<i64: 40, 1>}, {transform_indices = @transform_7, window_bounds = array<i64: 2, 40, 16>}]} {
    %c2_i32 = arith.constant 2 : i32
    %0 = arith.muli %arg0, %c2_i32 : i32
    %c4_i32 = arith.constant 4 : i32
    %1 = arith.subi %c4_i32, %0 : i32
    %c0_i32 = arith.constant 0 : i32
    %2 = arith.maxsi %1, %c0_i32 : i32
    %c2_i32_0 = arith.constant 2 : i32
    %3 = arith.minsi %2, %c2_i32_0 : i32
    %4 = tpu.iota {dimensions = array<i32: 1>} : vector<1x56xi32>
    %c0 = arith.constant 0 : index
    %c0_1 = arith.constant 0 : index
    %5 = vector.load %arg2[%c0, %c0_1] : memref<1x56xf32, #tpu.memory_space<vmem>>, vector<1x56xf32>
    %cst = arith.constant 5.000000e-01 : f32
    %6 = vector.broadcast %cst : f32 to vector<1x56xf32>
    %7 = arith.cmpf ogt, %5, %6 : vector<1x56xf32>
    %c24_i32 = arith.constant 24 : i32
    %8 = arith.muli %3, %c24_i32 : i32
    %c4_i32_2 = arith.constant 4 : i32
    %9 = arith.addi %c4_i32_2, %8 : i32
    %10 = vector.broadcast %9 : i32 to vector<1x56xi32>
    %11 = arith.cmpi slt, %4, %10 : vector<1x56xi32>
    %12 = arith.andi %7, %11 : vector<1x56xi1>
    %c0_3 = arith.constant 0 : index
    %c0_4 = arith.constant 0 : index
    %c0_5 = arith.constant 0 : index
    %13 = vector.load %arg1[%c0_3, %c0_4, %c0_5] : memref<1x8x56xbf16, #tpu.memory_space<vmem>>, vector<1x8x56xbf16>
    %14 = vector.shape_cast %13 : vector<1x8x56xbf16> to vector<8x56xbf16>
    %c0_6 = arith.constant 0 : index
    %c0_7 = arith.constant 0 : index
    %15 = vector.load %arg3[%c0_6, %c0_7] : memref<16x8xbf16, #tpu.memory_space<vmem>>, vector<16x8xbf16>
    %cst_8 = arith.constant dense<0.000000e+00> : vector<16x56xf32>
    %16 = tpu.matmul %15, %14, %cst_8 {dimension_numbers = #tpu.dot_dimension_numbers<[1], [0], [0], [1], [0, 0, 1, 1], [], []>} : vector<16x8xbf16>, vector<8x56xbf16>, vector<16x56xf32> -> vector<16x56xf32>
    %c0_9 = arith.constant 0 : index
    %c0_10 = arith.constant 0 : index
    %17 = vector.load %arg4[%c0_9, %c0_10] : memref<16x1xf32, #tpu.memory_space<vmem>>, vector<16x1xf32>
    %18 = vector.broadcast %17 : vector<16x1xf32> to vector<16x56xf32>
    %19 = arith.addf %16, %18 : vector<16x56xf32>
    %cst_11 = arith.constant 0.000000e+00 : f32
    %20 = vector.shape_cast %12 : vector<1x56xi1> to vector<1x56xi1>
    %21 = vector.broadcast %20 : vector<1x56xi1> to vector<16x56xi1>
    %22 = vector.broadcast %cst_11 : f32 to vector<16x56xf32>
    %23 = arith.select %21, %19, %22 : vector<16x56xi1>, vector<16x56xf32>
    %24 = arith.truncf %23 : vector<16x56xf32> to vector<16x56xbf16>
    %cst_12 = arith.constant -3.004060e+38 : bf16
    %25 = vector.shape_cast %12 : vector<1x56xi1> to vector<1x56xi1>
    %26 = vector.broadcast %25 : vector<1x56xi1> to vector<8x56xi1>
    %27 = vector.broadcast %cst_12 : bf16 to vector<8x56xbf16>
    %28 = arith.select %26, %14, %27 : vector<8x56xi1>, vector<8x56xbf16>
    %29 = vector.extract_strided_slice %28 {offsets = [0, 3], sizes = [8, 48], strides = [1, 1]} : vector<8x56xbf16> to vector<8x48xbf16>
    %30 = vector.extract_strided_slice %28 {offsets = [0, 4], sizes = [8, 48], strides = [1, 1]} : vector<8x56xbf16> to vector<8x48xbf16>
    %31 = arith.maximumf %29, %30 : vector<8x48xbf16>
    %32 = vector.extract_strided_slice %28 {offsets = [0, 5], sizes = [8, 48], strides = [1, 1]} : vector<8x56xbf16> to vector<8x48xbf16>
    %33 = arith.maximumf %31, %32 : vector<8x48xbf16>
    %c0_13 = arith.constant 0 : index
    %c0_14 = arith.constant 0 : index
    %34 = vector.load %arg6[%c0_13, %c0_14] : memref<40x8xbf16, #tpu.memory_space<vmem>>, vector<40x8xbf16>
    %cst_15 = arith.constant dense<0.000000e+00> : vector<40x48xf32>
    %35 = tpu.matmul %34, %33, %cst_15 {dimension_numbers = #tpu.dot_dimension_numbers<[1], [0], [0], [1], [0, 0, 1, 1], [], []>} : vector<40x8xbf16>, vector<8x48xbf16>, vector<40x48xf32> -> vector<40x48xf32>
    %c0_16 = arith.constant 0 : index
    %c0_17 = arith.constant 0 : index
    %c0_18 = arith.constant 0 : index
    %36 = vector.load %arg5[%c0_16, %c0_17, %c0_18] : memref<9x40x16xbf16, #tpu.memory_space<vmem>>, vector<1x40x16xbf16>
    %37 = vector.shape_cast %36 : vector<1x40x16xbf16> to vector<40x16xbf16>
    %38 = vector.extract_strided_slice %24 {offsets = [0, 0], sizes = [16, 48], strides = [1, 1]} : vector<16x56xbf16> to vector<16x48xbf16>
    %cst_19 = arith.constant dense<0.000000e+00> : vector<40x48xf32>
    %39 = tpu.matmul %37, %38, %cst_19 {dimension_numbers = #tpu.dot_dimension_numbers<[1], [0], [0], [1], [0, 0, 1, 1], [], []>} : vector<40x16xbf16>, vector<16x48xbf16>, vector<40x48xf32> -> vector<40x48xf32>
    %40 = arith.addf %35, %39 : vector<40x48xf32>
    %c1 = arith.constant 1 : index
    %c0_20 = arith.constant 0 : index
    %c0_21 = arith.constant 0 : index
    %41 = vector.load %arg5[%c1, %c0_20, %c0_21] : memref<9x40x16xbf16, #tpu.memory_space<vmem>>, vector<1x40x16xbf16>
    %42 = vector.shape_cast %41 : vector<1x40x16xbf16> to vector<40x16xbf16>
    %43 = vector.extract_strided_slice %24 {offsets = [0, 1], sizes = [16, 48], strides = [1, 1]} : vector<16x56xbf16> to vector<16x48xbf16>
    %cst_22 = arith.constant dense<0.000000e+00> : vector<40x48xf32>
    %44 = tpu.matmul %42, %43, %cst_22 {dimension_numbers = #tpu.dot_dimension_numbers<[1], [0], [0], [1], [0, 0, 1, 1], [], []>} : vector<40x16xbf16>, vector<16x48xbf16>, vector<40x48xf32> -> vector<40x48xf32>
    %45 = arith.addf %40, %44 : vector<40x48xf32>
    %c2 = arith.constant 2 : index
    %c0_23 = arith.constant 0 : index
    %c0_24 = arith.constant 0 : index
    %46 = vector.load %arg5[%c2, %c0_23, %c0_24] : memref<9x40x16xbf16, #tpu.memory_space<vmem>>, vector<1x40x16xbf16>
    %47 = vector.shape_cast %46 : vector<1x40x16xbf16> to vector<40x16xbf16>
    %48 = vector.extract_strided_slice %24 {offsets = [0, 2], sizes = [16, 48], strides = [1, 1]} : vector<16x56xbf16> to vector<16x48xbf16>
    %cst_25 = arith.constant dense<0.000000e+00> : vector<40x48xf32>
    %49 = tpu.matmul %47, %48, %cst_25 {dimension_numbers = #tpu.dot_dimension_numbers<[1], [0], [0], [1], [0, 0, 1, 1], [], []>} : vector<40x16xbf16>, vector<16x48xbf16>, vector<40x48xf32> -> vector<40x48xf32>
    %50 = arith.addf %45, %49 : vector<40x48xf32>
    %c3 = arith.constant 3 : index
    %c0_26 = arith.constant 0 : index
    %c0_27 = arith.constant 0 : index
    %51 = vector.load %arg5[%c3, %c0_26, %c0_27] : memref<9x40x16xbf16, #tpu.memory_space<vmem>>, vector<1x40x16xbf16>
    %52 = vector.shape_cast %51 : vector<1x40x16xbf16> to vector<40x16xbf16>
    %53 = vector.extract_strided_slice %24 {offsets = [0, 3], sizes = [16, 48], strides = [1, 1]} : vector<16x56xbf16> to vector<16x48xbf16>
    %cst_28 = arith.constant dense<0.000000e+00> : vector<40x48xf32>
    %54 = tpu.matmul %52, %53, %cst_28 {dimension_numbers = #tpu.dot_dimension_numbers<[1], [0], [0], [1], [0, 0, 1, 1], [], []>} : vector<40x16xbf16>, vector<16x48xbf16>, vector<40x48xf32> -> vector<40x48xf32>
    %55 = arith.addf %50, %54 : vector<40x48xf32>
    %c4 = arith.constant 4 : index
    %c0_29 = arith.constant 0 : index
    %c0_30 = arith.constant 0 : index
    %56 = vector.load %arg5[%c4, %c0_29, %c0_30] : memref<9x40x16xbf16, #tpu.memory_space<vmem>>, vector<1x40x16xbf16>
    %57 = vector.shape_cast %56 : vector<1x40x16xbf16> to vector<40x16xbf16>
    %58 = vector.extract_strided_slice %24 {offsets = [0, 4], sizes = [16, 48], strides = [1, 1]} : vector<16x56xbf16> to vector<16x48xbf16>
    %cst_31 = arith.constant dense<0.000000e+00> : vector<40x48xf32>
    %59 = tpu.matmul %57, %58, %cst_31 {dimension_numbers = #tpu.dot_dimension_numbers<[1], [0], [0], [1], [0, 0, 1, 1], [], []>} : vector<40x16xbf16>, vector<16x48xbf16>, vector<40x48xf32> -> vector<40x48xf32>
    %60 = arith.addf %55, %59 : vector<40x48xf32>
    %c5 = arith.constant 5 : index
    %c0_32 = arith.constant 0 : index
    %c0_33 = arith.constant 0 : index
    %61 = vector.load %arg5[%c5, %c0_32, %c0_33] : memref<9x40x16xbf16, #tpu.memory_space<vmem>>, vector<1x40x16xbf16>
    %62 = vector.shape_cast %61 : vector<1x40x16xbf16> to vector<40x16xbf16>
    %63 = vector.extract_strided_slice %24 {offsets = [0, 5], sizes = [16, 48], strides = [1, 1]} : vector<16x56xbf16> to vector<16x48xbf16>
    %cst_34 = arith.constant dense<0.000000e+00> : vector<40x48xf32>
    %64 = tpu.matmul %62, %63, %cst_34 {dimension_numbers = #tpu.dot_dimension_numbers<[1], [0], [0], [1], [0, 0, 1, 1], [], []>} : vector<40x16xbf16>, vector<16x48xbf16>, vector<40x48xf32> -> vector<40x48xf32>
    %65 = arith.addf %60, %64 : vector<40x48xf32>
    %c6 = arith.constant 6 : index
    %c0_35 = arith.constant 0 : index
    %c0_36 = arith.constant 0 : index
    %66 = vector.load %arg5[%c6, %c0_35, %c0_36] : memref<9x40x16xbf16, #tpu.memory_space<vmem>>, vector<1x40x16xbf16>
    %67 = vector.shape_cast %66 : vector<1x40x16xbf16> to vector<40x16xbf16>
    %68 = vector.extract_strided_slice %24 {offsets = [0, 6], sizes = [16, 48], strides = [1, 1]} : vector<16x56xbf16> to vector<16x48xbf16>
    %cst_37 = arith.constant dense<0.000000e+00> : vector<40x48xf32>
    %69 = tpu.matmul %67, %68, %cst_37 {dimension_numbers = #tpu.dot_dimension_numbers<[1], [0], [0], [1], [0, 0, 1, 1], [], []>} : vector<40x16xbf16>, vector<16x48xbf16>, vector<40x48xf32> -> vector<40x48xf32>
    %70 = arith.addf %65, %69 : vector<40x48xf32>
    %c7 = arith.constant 7 : index
    %c0_38 = arith.constant 0 : index
    %c0_39 = arith.constant 0 : index
    %71 = vector.load %arg5[%c7, %c0_38, %c0_39] : memref<9x40x16xbf16, #tpu.memory_space<vmem>>, vector<1x40x16xbf16>
    %72 = vector.shape_cast %71 : vector<1x40x16xbf16> to vector<40x16xbf16>
    %73 = vector.extract_strided_slice %24 {offsets = [0, 7], sizes = [16, 48], strides = [1, 1]} : vector<16x56xbf16> to vector<16x48xbf16>
    %cst_40 = arith.constant dense<0.000000e+00> : vector<40x48xf32>
    %74 = tpu.matmul %72, %73, %cst_40 {dimension_numbers = #tpu.dot_dimension_numbers<[1], [0], [0], [1], [0, 0, 1, 1], [], []>} : vector<40x16xbf16>, vector<16x48xbf16>, vector<40x48xf32> -> vector<40x48xf32>
    %75 = arith.addf %70, %74 : vector<40x48xf32>
    %c8 = arith.constant 8 : index
    %c0_41 = arith.constant 0 : index
    %c0_42 = arith.constant 0 : index
    %76 = vector.load %arg5[%c8, %c0_41, %c0_42] : memref<9x40x16xbf16, #tpu.memory_space<vmem>>, vector<1x40x16xbf16>
    %77 = vector.shape_cast %76 : vector<1x40x16xbf16> to vector<40x16xbf16>
    %78 = vector.extract_strided_slice %24 {offsets = [0, 8], sizes = [16, 48], strides = [1, 1]} : vector<16x56xbf16> to vector<16x48xbf16>
    %cst_43 = arith.constant dense<0.000000e+00> : vector<40x48xf32>
    %79 = tpu.matmul %77, %78, %cst_43 {dimension_numbers = #tpu.dot_dimension_numbers<[1], [0], [0], [1], [0, 0, 1, 1], [], []>} : vector<40x16xbf16>, vector<16x48xbf16>, vector<40x48xf32> -> vector<40x48xf32>
    %80 = arith.addf %75, %79 : vector<40x48xf32>
    %c0_44 = arith.constant 0 : index
    %c0_45 = arith.constant 0 : index
    %81 = vector.load %arg7[%c0_44, %c0_45] : memref<40x1xf32, #tpu.memory_space<vmem>>, vector<40x1xf32>
    %82 = vector.broadcast %81 : vector<40x1xf32> to vector<40x48xf32>
    %83 = arith.addf %80, %82 : vector<40x48xf32>
    %cst_46 = arith.constant 0.000000e+00 : f32
    %84 = vector.broadcast %cst_46 : f32 to vector<40x48xf32>
    %85 = arith.maximumf %83, %84 : vector<40x48xf32>
    %86 = vector.extract_strided_slice %85 {offsets = [0, 4], sizes = [40, 16], strides = [1, 1]} : vector<40x48xf32> to vector<40x16xf32>
    %c0_47 = arith.constant 0 : index
    %c0_48 = arith.constant 0 : index
    %c0_49 = arith.constant 0 : index
    %87 = vector.load %arg8[%c0_47, %c0_48, %c0_49] : memref<2x40x16xf32, #tpu.memory_space<vmem>>, vector<1x40x16xf32>
    %88 = vector.shape_cast %87 : vector<1x40x16xf32> to vector<40x16xf32>
    %89 = vector.shape_cast %86 : vector<40x16xf32> to vector<1x40x16xf32>
    tpu.vector_store %arg8[%c0_47, %c0_48, %c0_49], %89 {strides = array<i32>} : memref<2x40x16xf32, #tpu.memory_space<vmem>>, vector<1x40x16xf32>,
    %90 = vector.extract_strided_slice %85 {offsets = [0, 28], sizes = [40, 16], strides = [1, 1]} : vector<40x48xf32> to vector<40x16xf32>
    %c1_50 = arith.constant 1 : index
    %c0_51 = arith.constant 0 : index
    %c0_52 = arith.constant 0 : index
    %91 = vector.load %arg8[%c1_50, %c0_51, %c0_52] : memref<2x40x16xf32, #tpu.memory_space<vmem>>, vector<1x40x16xf32>
    %92 = vector.shape_cast %91 : vector<1x40x16xf32> to vector<40x16xf32>
    %93 = vector.shape_cast %90 : vector<40x16xf32> to vector<1x40x16xf32>
    tpu.vector_store %arg8[%c1_50, %c0_51, %c0_52], %93 {strides = array<i32>} : memref<2x40x16xf32, #tpu.memory_space<vmem>>, vector<1x40x16xf32>,
    return
  }
  func.func @transform_0(%arg0: i32) -> (i32, i32, i32) {
    %c0_i32 = arith.constant 0 : i32
    %c0_i32_0 = arith.constant 0 : i32
    %c0_i32_1 = arith.constant 0 : i32
    return %arg0, %c0_i32, %c0_i32_0 : i32, i32, i32
  }
  func.func @transform_1(%arg0: i32) -> (i32, i32) {
    %c0_i32 = arith.constant 0 : i32
    %c0_i32_0 = arith.constant 0 : i32
    %c0_i32_1 = arith.constant 0 : i32
    return %c0_i32, %c0_i32_0 : i32, i32
  }
  func.func @transform_2(%arg0: i32) -> (i32, i32) {
    %c0_i32 = arith.constant 0 : i32
    %c0_i32_0 = arith.constant 0 : i32
    %c0_i32_1 = arith.constant 0 : i32
    return %c0_i32, %c0_i32_0 : i32, i32
  }
  func.func @transform_3(%arg0: i32) -> (i32, i32) {
    %c0_i32 = arith.constant 0 : i32
    %c0_i32_0 = arith.constant 0 : i32
    %c0_i32_1 = arith.constant 0 : i32
    return %c0_i32, %c0_i32_0 : i32, i32
  }
  func.func @transform_4(%arg0: i32) -> (i32, i32, i32) {
    %c0_i32 = arith.constant 0 : i32
    %c0_i32_0 = arith.constant 0 : i32
    %c0_i32_1 = arith.constant 0 : i32
    %c0_i32_2 = arith.constant 0 : i32
    return %c0_i32, %c0_i32_0, %c0_i32_1 : i32, i32, i32
  }
  func.func @transform_5(%arg0: i32) -> (i32, i32) {
    %c0_i32 = arith.constant 0 : i32
    %c0_i32_0 = arith.constant 0 : i32
    %c0_i32_1 = arith.constant 0 : i32
    return %c0_i32, %c0_i32_0 : i32, i32
  }
  func.func @transform_6(%arg0: i32) -> (i32, i32) {
    %c0_i32 = arith.constant 0 : i32
    %c0_i32_0 = arith.constant 0 : i32
    %c0_i32_1 = arith.constant 0 : i32
    return %c0_i32, %c0_i32_0 : i32, i32
  }
  func.func @transform_7(%arg0: i32) -> (i32, i32, i32) {
    %c0_i32 = arith.constant 0 : i32
    %c0_i32_0 = arith.constant 0 : i32
    %c0_i32_1 = arith.constant 0 : i32
    return %arg0, %c0_i32, %c0_i32_0 : i32, i32, i32
  }
}

</mosaic_0001>

<bundles_post_ra>
// kernel: _lambda_.3
= control target key start
LH: loop header
LB: loop body
LE: loop exit
PB: predicated region body
PF: predicated region fallthrough
CT: control target
= control target key end

     0   :  { %s1872_s24 = smov 0   ;;  %s2150_s0 = inlined_call_operand.vmem [shape: bf16[2,8,56], index: 0, kind: input, shape index: {}]   ;;  %s2151_s1 = inlined_call_operand.vmem [shape: f32[1,56], index: 1, kind: input, shape index: {}]   ;;  %s2152_s2 = inlined_call_operand.vmem [shape: bf16[16,8], index: 2, kind: input, shape index: {}]   ;;  %s2153_s3 = inlined_call_operand.vmem [shape: f32[16,1], index: 3, kind: input, shape index: {}]   ;;  %s2154_s4 = inlined_call_operand.vmem [shape: bf16[9,40,16], index: 4, kind: input, shape index: {}]   ;;  %s2155_s5 = inlined_call_operand.vmem [shape: bf16[40,8], index: 5, kind: input, shape index: {}]   ;;  %s2156_s6 = inlined_call_operand.vmem [shape: f32[40,1], index: 6, kind: input, shape index: {}]   ;;  %s2157_s7 = inlined_call_operand.vmem [shape: f32[4,40,16], index: 7, kind: output, shape index: {}]  }
   0x1 LB: > { %s1441_s25 = sadd.s32 4294967295, %s1818_s24   ;;  %p1445_p0 = scmp.ge.s32.totalorder %s1818_s24, 1  ;;  %s1818_s24 = sphi %s1872_s24, %s17_s24  }
   0x2   : > { %p236_p1 = scmp.lt.s32.totalorder %s1818_s24, 3 }
   0x4   : > { %p237_p2 = pnand %p1445_p0, %p236_p1 }
   0x5   : > { %p268_p3 = scmp.lt.s32.totalorder (!%p237_p2), %s1441_s25, 1  ;;  %v1820_v0 = vmov (!%p237_p2), 0.0   ;;  %vm1821_vm0 = vmmov (!%p237_p2), 0   ;;  %s1883_s26 = sshll.u32 (!%p237_p2), %s1441_s25, 1  ;;  %v1822_v1 = vmov (!%p237_p2), 0   ;;  %v299_v2 = vld [vmem:[%s2153_s3] sm:$0xff] (!%p237_p2)  ;;  %v287_v4 = vlaneseq (!%p237_p2) }
   0x6   : > { %240 = sbr.rel (%p237_p2) target bundleno = 786 (0x312), region = 48  ;;  %1612 = vmatprep.subr.bf16.mxu0 (!%p237_p2), %v1820_v0  ;;  %1614 = vmatprep.mubr.msk.bf16.mxu0 (!%p237_p2), %vm1821_vm0, %v1820_v0  ;;  %s282_s29 = ssub.s32 (!%p237_p2), 4, %s1883_s26  ;;  %vm320_vm1 = vcmask (!%p237_p2), 1043456   ;;  %v300_v3 = vld [vmem:[%s2153_s3 + $0x8] sm:$0xff] (!%p237_p2)  ;;  %v1781_v6 = vld [vmem:[%s2152_s2] sm:$0xff] (!%p237_p2)   ;;  %vm316_vm2 = vcmask (!%p237_p2), 64512  }
   0x7   : > { %1779 = vset.pattern.permute.xlu1 (!%p237_p2), %v1822_v1  ;;  %1618 = vmatprep.subr.bf16.mxu1 (!%p237_p2), %v1820_v0  ;;  %p283_p4 = scmp.gt.s32.totalorder (!%p237_p2), %s282_s29, 0  ;;  %p1450_p5 = scmp.lt.s32.totalorder (!%p237_p2), %s282_s29, 2  ;;  %v289_v8 = vld [vmem:[%s2151_s1] sm:$0x1] (!%p237_p2)  ;;  %v367_v9 = vshrl.u32 (!%p237_p2), %v287_v4, 7  ;;  %v288_v10 = vand.u32 (!%p237_p2), 127, %v287_v4 }
   0x8   : > { %303 = vperm.xlu1 (!%p237_p2), %1779, %v299_v2   ;;  %1620 = vmatprep.mubr.msk.bf16.mxu1 (!%p237_p2), %vm1821_vm0, %v1820_v0  ;;  %vm290_vm3 = vcmp.gt.f32.partialorder (!%p237_p2), %v289_v8, 0.5  ;;  %s1823_s19 = smov (!%p237_p2), 127   ;;  %s1824_s20 = smov (!%p237_p2), 126   ;;  %v1782_v34 = vld [vmem:[%s2154_s4] sm:$0xff] (!%p237_p2)   ;;  %vm408_vm8 = vcmask (!%p237_p2), 130048   ;;  %v1784_v35 = vld [vmem:[%s2154_s4 + $0x8] sm:$0xff] (!%p237_p2)  }
   0x9   : > { %1780 = vset.pattern.permute.xlu0 (!%p237_p2), %v1822_v1  ;;  %v368_v11 = vsub.s32 (!%p237_p2), 0, %v367_v9  ;;  %s1825_s21 = smov (!%p237_p2), 125   ;;  %s1829_s8 = smov (!%p237_p2), 120   ;;  %v1297_v36 = vld [vmem:[%s2156_s6] sm:$0xff] (!%p237_p2)  ;;  %v1786_v37 = vld [vmem:[%s2154_s4 + $0x10] ss:$0 sps:$4 sm:$0xff] (!%p237_p2)  }
   0xa   : > { %s1830_s9 = smov (!%p237_p2), 121   ;;  %v1299_v38 = vld [vmem:[%s2156_s6 + $0x10] sm:$0xff] (!%p237_p2)  ;;  %v1300_v39 = vld [vmem:[%s2156_s6 + $0x18] sm:$0xff] (!%p237_p2)  ;;  %v1783_v42 = vld [vmem:[%s2155_s5] sm:$0xff] (!%p237_p2)   ;;  %s1831_s16 = smov (!%p237_p2), 100  }
   0xb   : > { %v1785_v43 = vld [vmem:[%s2155_s5 + $0x8] sm:$0xff] (!%p237_p2)   ;;  %v1787_v44 = vld [vmem:[%s2155_s5 + $0x10] ss:$0 sps:$4 sm:$0xff] (!%p237_p2)   ;;  %v1301_v46 = vld [vmem:[%s2156_s6 + $0x20] sm:$0xff] (!%p237_p2)  ;;  %p273_p6 = scmp.lt.s32.totalorder (!%p237_p2), %s1883_s26, 3 }
   0xc   : > { %308 = vperm.xlu1 (!%p237_p2), %1779, %v300_v3   ;;  %v1298_v45 = vld [vmem:[%s2156_s6 + $0x8] sm:$0xff] (!%p237_p2)  ;;  %v1789_v50 = vld [vmem:[%s2154_s4 + $0x14] sm:$0xff] (!%p237_p2)   ;;  %v1791_v54 = vld [vmem:[%s2154_s4 + $0x1c] sm:$0xff] (!%p237_p2)  }
   0xd   : > { %s2161_s25 = smov (!%p268_p3, %s1441_s25), 1  ;;  %s2163_s29 = smov (!%p283_p4, %s282_s29), 0  ;;  %v1788_v49 = vld [vmem:[%s2154_s4 + $0x28] sm:$0xff]   ;;  %v1790_v53 = vld [vmem:[%s2154_s4 + $0x30] sm:$0xff]   ;;  %v1792_v55 = vld [vmem:[%s2154_s4 + $0x24] ss:$0 sps:$4 sm:$0xff]  }
   0xe   : > { %s1446_s30 = sshll.u32 %s2161_s25, 2  ;;  %s2165_s29 = smov (!%p1450_p5, %s2163_s29), 2  ;;  %v1793_v56 = vld [vmem:[%s2154_s4 + $0x38] ss:$0 sps:$4 sm:$0xff]   ;;  %v1794_v57 = vld [vmem:[%s2154_s4 + $0x3c] sm:$0xff]   ;;  %v1795_v58 = vld [vmem:[%s2154_s4 + $0x50] sm:$0xff]  }
   0xf   : > { %s271_s12 = scalar_lea.vmem %s2150_s0, %s1446_s30  ;;  %s291_s17 = smul.u32 24, %s2165_s29  ;;  %v1796_v61 = vld [vmem:[%s2154_s4 + $0x44] sm:$0xff]   ;;  %v1797_v62 = vld [vmem:[%s2154_s4 + $0x58] sm:$0xff]   ;;  %v1798_v63 = vld [vmem:[%s2154_s4 + $0x4c] ss:$0 sps:$4 sm:$0xff]  }
  0x10   : > { %v296_v5 = vld [vmem:[%s271_s12] sm:$0xf]  ;;  %s1826_s25 = smov 124   ;;  %s1827_s29 = smov 122   ;;  %v1800_v2 = vld [vmem:[%s2154_s4 + $0x64] sm:$0xff]   ;;  %v1801_v3 = vld [vmem:[%s2154_s4 + $0x78] sm:$0xff]  }
  0x11   : > { %v322_v7 = vsel %vm320_vm1, %v296_v5, 0  ;;  %s292_s18 = sadd.s32 4, %s291_s17  ;;  %s1828_s30 = smov 123   ;;  %v1804_v8 = vld [vmem:[%s2154_s4 + $0x74] ss:$0 sps:$4 sm:$0xff]  }
  0x12   : > { %1613 = vmatpush3.bf16.msra.mxu0 %v322_v7  ;;  %v293_v12 = vstv %s292_s18  ;;  %v1803_v7 = vld [vmem:[%s2154_s4 + $0x80] sm:$0xff]   ;;  %v1805_v9 = vld [vmem:[%s2154_s4 + $0x88] ss:$0 sps:$4 sm:$0xff]   ;;  %v1811_v15 = vld [vmem:[%s2154_s4 + $0xb0] ss:$0 sps:$4 sm:$0xff]   ;;  %s2167_s26 = smov (!%p273_p6, %s1883_s26), 3 }
  0x13   : > { %1632 = vmatprep.subr.bf16.mxu0 %v1820_v0  ;;  %vm294_vm4 = vcmp.lt.s32.totalorder %v288_v10, %v293_v12  ;;  %v1806_v10 = vld [vmem:[%s2154_s4 + $0x8c] sm:$0xff]   ;;  %v1808_v12 = vld [vmem:[%s2154_s4 + $0x94] sm:$0xff]   ;;  %s1758_s17 = smul.u32 40, %s2167_s26 }
  0x14   : > { %vm295_vm5 = vmand %vm290_vm3, %vm294_vm4 }
  0x15   : > { %1615 = vmatmul.mubr.msk.bf16.vlgmr.msra.gmra.mrb[0].mxu0 %vm316_vm2, %v1781_v6  ;;  %v365_v13 = vsel %vm295_vm5, 1, %v1822_v1  ;;  %v1799_v1 = vld [vmem:[%s2154_s4 + $0x60] ss:$0 sps:$4 sm:$0xff]   ;;  %v1802_v6 = vld [vmem:[%s2154_s4 + $0x6c] sm:$0xff]  }
  0x16   : > { %1634 = vmatprep.mubr.msk.bf16.mxu0 %vm1821_vm0, %v1820_v0  ;;  %v369_v14 = vrot.slane %v365_v13, %v368_v11  ;;  %v1807_v11 = vld [vmem:[%s2154_s4 + $0xa0] sm:$0xff]   ;;  %v1809_v13 = vld [vmem:[%s2154_s4 + $0xa8] sm:$0xff]  }
  0x18   : > { %vm370_vm6 = vcmp.eq.s32.totalorder %v369_v14, 1  ;;  %v1810_v14 = vld [vmem:[%s2154_s4 + $0x9c] ss:$0 sps:$4 sm:$0xff]  }
  0x19   : > { %vm1911_vm7 = vmpackc.low %vm370_vm6, %vm370_vm6 }
  0x1a   : > { %v375_v16 = vsel %vm1911_vm7, %v296_v5, 4284677986 }
  0x1b   : > { %377 = vrot.lane.b32.xlu0 %v375_v16, %s1823_s19 }
  0x1f   : > { %381 = vrot.lane.b32.xlu0 %v375_v16, %s1824_s20 }
  0x87   : > { %v304_v22 = vpop.permute.xlu1 %303 }
  0x8b   : > { %v309_v26 = vpop.permute.xlu1 %308 }
  0x8d   : > { %v378_v17 = vpop.permute.xlu0 %377 }
  0x8e   : > { %v380_v18 = vmax.bf16 %v378_v17, %v375_v16 }
  0x91   : > { %v382_v19 = vpop.permute.xlu0 %381 }
  0x92   : > { %v384_v20 = vmax.bf16 %v382_v19, %v380_v18 }
  0x94   : > { %v1469_v21 = vcombine.low %v384_v20, %v384_v20 }
  0x96   : > { %490 = vrot.lane.b32.xlu0 %v1469_v21, %s1825_s21 }
  0xe8   : > { %v358_v23 = vpop.f32.mrb[0].mxu0 }
  0xe9   : > { %v359_v24 = vadd.f32 %v358_v23, %v304_v22  ;;  %v1616_v25 = vpop.f32.mrb[1].mxu0 }
  0xea   : > { %v361_v27 = vpop.f32.mrb[2].mxu0 }
  0xeb   : > { %v362_v28 = vadd.f32 %v361_v27, %v309_v26  ;;  %v1617_v29 = vpop.f32.mrb[3].mxu0  ;;  %v371_v30 = vsel %vm370_vm6, %v359_v24, 0.0 }
  0xed   : > { %v372_v31 = vsel %vm370_vm6, %v362_v28, 0.0  ;;  %v1461_v32 = vpack.c.bf16 %v362_v28, %v359_v24 }
  0xee   : > { %v373_v33 = vpack.c.bf16 %v372_v31, %v371_v30 }
  0xef   : > { %1619 = vmatpush3.bf16.msk.msra.mxu1 %vm1911_vm7, %v1461_v32 }
  0xf0   : > { %672 = vrot.lane.b32.xlu0 %v373_v33, %s1824_s20  ;;  %580 = vrot.lane.b32.xlu1 %v373_v33, %s1823_s19  ;;  %s277_s20 = scalar_lea.vmem %s2157_s7, %s1758_s17 }
  0xf1   : > { %1646 = vmatprep.subr.bf16.mxu1 %v1820_v0 }
  0xf2   : > { %1621 = vmatmul.mubr.msk.bf16.vlgmr.msra.gmra.mrb[0].mxu1 %vm408_vm8, %v1782_v34 }
  0xf3   : > { %1624 = vmatprep.mubr.msk.bf16.mxu1 %vm1821_vm0, %v1820_v0 }
  0xf4   : > { %856 = vrot.lane.b32.xlu0 %v373_v33, %s1826_s25  ;;  %764 = vrot.lane.b32.xlu1 %v373_v33, %s1825_s21 }
  0xf8   : > { %1040 = vrot.lane.b32.xlu0 %v373_v33, %s1827_s29  ;;  %948 = vrot.lane.b32.xlu1 %v373_v33, %s1828_s30 }
  0xfa   : > { %1625 = vmatmul.mubr.msk.bf16.gmra.mrb[4].mxu1 %vm408_vm8, %v1784_v35 }
  0xfb   : > { %1628 = vmatprep.mubr.msk.bf16.mxu1 %vm1821_vm0, %v1820_v0 }
  0xfc   : > { %1224 = vrot.lane.b32.xlu0 %v373_v33, %s1829_s8  ;;  %1132 = vrot.lane.b32.xlu1 %v373_v33, %s1830_s9 }
 0x100   : > { %1304 = vperm.xlu1 %1779, %v1297_v36   ;;  %1309 = vperm.xlu0 %1780, %v1298_v45  }
 0x102   : > { %1629 = vmatmul.mubr.msk.bf16.gmra.mrb[8].mxu1 %vm408_vm8, %v1786_v37 }
 0x103   : > { %1648 = vmatprep.mubr.msk.bf16.mxu1 %vm1821_vm0, %v1820_v0 }
 0x104   : > { %1314 = vperm.xlu1 %1779, %v1299_v38   ;;  %1324 = vperm.xlu0 %1780, %v1301_v46  }
 0x108   : > { %1319 = vperm.xlu1 %1779, %v1300_v39   ;;  %v491_v40 = vpop.permute.xlu0 %490 }
 0x109   : > { %v502_v41 = vsel %vm320_vm1, %v491_v40, 0 }
 0x10a   : > { %1633 = vmatpush3.bf16.msra.mxu0 %v502_v41 }
 0x10b   : > { %1660 = vmatprep.subr.bf16.mxu0 %v1820_v0 }
 0x10d   : > { %1635 = vmatmul.mubr.msk.bf16.vlgmr.msra.gmra.mrb[4].mxu0 %vm316_vm2, %v1783_v42 }
 0x10e   : > { %1638 = vmatprep.mubr.msk.bf16.mxu0 %vm1821_vm0, %v1820_v0 }
 0x115   : > { %1639 = vmatmul.mubr.msk.bf16.gmra.mrb[8].mxu0 %vm316_vm2, %v1785_v43 }
 0x116   : > { %1642 = vmatprep.mubr.msk.bf16.mxu0 %vm1821_vm0, %v1820_v0 }
 0x11d   : > { %1643 = vmatmul.mubr.msk.bf16.gmra.mrb[12].mxu0 %vm316_vm2, %v1787_v44 }
 0x11e   : > { %1662 = vmatprep.mubr.msk.bf16.mxu0 %vm1821_vm0, %v1820_v0 }
 0x162   : > { %v673_v47 = vpop.permute.xlu0 %672  ;;  %v581_v48 = vpop.permute.xlu1 %580 }
 0x163   : > { %1647 = vmatpush3.bf16.msra.mxu1 %v581_v48  ;;  %1661 = vmatpush3.bf16.msra.mxu0 %v673_v47 }
 0x164   : > { %1688 = vmatprep.subr.bf16.mxu0 %v1820_v0  ;;  %1674 = vmatprep.subr.bf16.mxu1 %v1820_v0 }
 0x166   : > { %1663 = vmatmul.mubr.msk.bf16.vlgmr.msra.gmra.mrb[16].mxu0 %vm408_vm8, %v1788_v49  ;;  %v857_v51 = vpop.permute.xlu0 %856  ;;  %1649 = vmatmul.mubr.msk.bf16.vlgmr.msra.gmra.mrb[12].mxu1 %vm408_vm8, %v1789_v50  ;;  %v765_v52 = vpop.permute.xlu1 %764 }
 0x167   : > { %1675 = vmatpush3.bf16.msra.mxu1 %v765_v52  ;;  %1689 = vmatpush3.bf16.msra.mxu0 %v857_v51 }
 0x168   : > { %1652 = vmatprep.mubr.msk.bf16.mxu1 %vm1821_vm0, %v1820_v0  ;;  %1666 = vmatprep.mubr.msk.bf16.mxu0 %vm1821_vm0, %v1820_v0 }
 0x169   : > { %1702 = vmatprep.subr.bf16.mxu1 %v1820_v0  ;;  %1716 = vmatprep.subr.bf16.mxu0 %v1820_v0 }
 0x16a   : > { %v1041_v59 = vpop.permute.xlu0 %1040  ;;  %v949_v60 = vpop.permute.xlu1 %948 }
 0x16e   : > { %1667 = vmatmul.mubr.msk.bf16.gmra.mrb[20].mxu0 %vm408_vm8, %v1790_v53  ;;  %1653 = vmatmul.mubr.msk.bf16.gmra.mrb[16].mxu1 %vm408_vm8, %v1791_v54  ;;  %v1225_v4 = vpop.permute.xlu0 %1224  ;;  %v1133_v5 = vpop.permute.xlu1 %1132 }
 0x16f   : > { %1656 = vmatprep.mubr.msk.bf16.mxu1 %vm1821_vm0, %v1820_v0  ;;  %1670 = vmatprep.mubr.msk.bf16.mxu0 %vm1821_vm0, %v1820_v0 }
 0x176   : > { %1657 = vmatmul.mubr.msk.bf16.gmra.mrb[20].mxu1 %vm408_vm8, %v1792_v55  ;;  %1671 = vmatmul.mubr.msk.bf16.gmra.mrb[24].mxu0 %vm408_vm8, %v1793_v56 }
 0x177   : > { %1676 = vmatprep.mubr.msk.bf16.mxu1 %vm1821_vm0, %v1820_v0  ;;  %1690 = vmatprep.mubr.msk.bf16.mxu0 %vm1821_vm0, %v1820_v0 }
 0x17e   : > { %1677 = vmatmul.mubr.msk.bf16.vlgmr.msra.gmra.mrb[24].mxu1 %vm408_vm8, %v1794_v57  ;;  %1691 = vmatmul.mubr.msk.bf16.vlgmr.msra.gmra.mrb[28].mxu0 %vm408_vm8, %v1795_v58 }
 0x17f   : > { %1703 = vmatpush3.bf16.msra.mxu1 %v949_v60  ;;  %1717 = vmatpush3.bf16.msra.mxu0 %v1041_v59 }
 0x180   : > { %1680 = vmatprep.mubr.msk.bf16.mxu1 %vm1821_vm0, %v1820_v0  ;;  %1694 = vmatprep.mubr.msk.bf16.mxu0 %vm1821_vm0, %v1820_v0 }
 0x181   : > { %1730 = vmatprep.subr.bf16.mxu1 %v1820_v0  ;;  %1744 = vmatprep.subr.bf16.mxu0 %v1820_v0 }
 0x186   : > { %1681 = vmatmul.mubr.msk.bf16.gmra.mrb[28].mxu1 %vm408_vm8, %v1796_v61  ;;  %1695 = vmatmul.mubr.msk.bf16.gmra.mrb[32].mxu0 %vm408_vm8, %v1797_v62 }
 0x187   : > { %1684 = vmatprep.mubr.msk.bf16.mxu1 %vm1821_vm0, %v1820_v0  ;;  %1698 = vmatprep.mubr.msk.bf16.mxu0 %vm1821_vm0, %v1820_v0 }
 0x18e   : > { %1685 = vmatmul.mubr.msk.bf16.gmra.mrb[32].mxu1 %vm408_vm8, %v1798_v63  ;;  %1699 = vmatmul.mubr.msk.bf16.gmra.mrb[36].mxu0 %vm408_vm8, %v1799_v1 }
 0x18f   : > { %1704 = vmatprep.mubr.msk.bf16.mxu1 %vm1821_vm0, %v1820_v0  ;;  %1718 = vmatprep.mubr.msk.bf16.mxu0 %vm1821_vm0, %v1820_v0 }
 0x196   : > { %1705 = vmatmul.mubr.msk.bf16.vlgmr.msra.gmra.mrb[36].mxu1 %vm408_vm8, %v1800_v2  ;;  %1719 = vmatmul.mubr.msk.bf16.vlgmr.msra.gmra.mrb[40].mxu0 %vm408_vm8, %v1801_v3 }
 0x197   : > { %1731 = vmatpush3.bf16.msra.mxu1 %v1133_v5  ;;  %1745 = vmatpush3.bf16.msra.mxu0 %v1225_v4 }
 0x198   : > { %1708 = vmatprep.mubr.msk.bf16.mxu1 %vm1821_vm0, %v1820_v0  ;;  %1722 = vmatprep.mubr.msk.bf16.mxu0 %vm1821_vm0, %v1820_v0 }
 0x19e   : > { %1709 = vmatmul.mubr.msk.bf16.gmra.mrb[40].mxu1 %vm408_vm8, %v1802_v6  ;;  %1723 = vmatmul.mubr.msk.bf16.gmra.mrb[44].mxu0 %vm408_vm8, %v1803_v7 }
 0x19f   : > { %1712 = vmatprep.mubr.msk.bf16.mxu1 %vm1821_vm0, %v1820_v0  ;;  %1726 = vmatprep.mubr.msk.bf16.mxu0 %vm1821_vm0, %v1820_v0 }
 0x1a6   : > { %1713 = vmatmul.mubr.msk.bf16.gmra.mrb[44].mxu1 %vm408_vm8, %v1804_v8  ;;  %1727 = vmatmul.mubr.msk.bf16.gmra.mrb[48].mxu0 %vm408_vm8, %v1805_v9 }
 0x1a7   : > { %1732 = vmatprep.mubr.msk.bf16.mxu1 %vm1821_vm0, %v1820_v0  ;;  %1746 = vmatprep.mubr.msk.bf16.mxu0 %vm1821_vm0, %v1820_v0 }
 0x1ae   : > { %1733 = vmatmul.mubr.msk.bf16.vlgmr.msra.gmra.mrb[48].mxu1 %vm408_vm8, %v1806_v10  ;;  %1747 = vmatmul.mubr.msk.bf16.vlgmr.msra.gmra.mrb[52].mxu0 %vm408_vm8, %v1807_v11 }
 0x1af   : > { %1736 = vmatprep.mubr.msk.bf16.mxu1 %vm1821_vm0, %v1820_v0  ;;  %1750 = vmatprep.mubr.msk.bf16.mxu0 %vm1821_vm0, %v1820_v0 }
 0x1b6   : > { %1737 = vmatmul.mubr.msk.bf16.gmra.mrb[52].mxu1 %vm408_vm8, %v1808_v12  ;;  %1751 = vmatmul.mubr.msk.bf16.gmra.mrb[56].mxu0 %vm408_vm8, %v1809_v13 }
 0x1b7   : > { %1740 = vmatprep.mubr.msk.bf16.mxu1 %vm1821_vm0, %v1820_v0  ;;  %1754 = vmatprep.mubr.msk.bf16.mxu0 %vm1821_vm0, %v1820_v0 }
 0x1be   : > { %1741 = vmatmul.mubr.msk.bf16.gmra.mrb[56].mxu1 %vm408_vm8, %v1810_v14  ;;  %1755 = vmatmul.mubr.msk.bf16.gmra.mrb[60].mxu0 %vm408_vm8, %v1811_v15 }
 0x1c5   : > { %v452_v16 = vpop.f32.mrb[0].mxu1 }
 0x1c6   : > { %v1622_v17 = vpop.f32.mrb[1].mxu1 }
 0x1c7   : > { %v455_v18 = vpop.f32.mrb[2].mxu1 }
 0x1c8   : > { %v1623_v19 = vpop.f32.mrb[3].mxu1 }
 0x1cd   : > { %v460_v20 = vpop.f32.mrb[4].mxu1 }
 0x1ce   : > { %v1626_v21 = vpop.f32.mrb[5].mxu1 }
 0x1cf   : > { %v463_v22 = vpop.f32.mrb[6].mxu1 }
 0x1d0   : > { %v1627_v0 = vpop.f32.mrb[7].mxu1 }
 0x1d5   : > { %v468_v23 = vpop.f32.mrb[8].mxu1 }
 0x1d6   : > { %v1630_v24 = vpop.f32.mrb[9].mxu1 }
 0x1d7   : > { %v471_v25 = vpop.f32.mrb[10].mxu1 }
 0x1d8   : > { %v1631_v26 = vpop.f32.mrb[11].mxu1 }
 0x1e0   : > { %v538_v27 = vpop.f32.mrb[4].mxu0 }
 0x1e1   : > { %v539_v28 = vadd.f32 %v538_v27, %v452_v16  ;;  %v1636_v29 = vpop.f32.mrb[5].mxu0 }
 0x1e2   : > { %v541_v30 = vpop.f32.mrb[6].mxu0 }
 0x1e3   : > { %v542_v31 = vadd.f32 %v541_v30, %v455_v18  ;;  %v1637_v32 = vpop.f32.mrb[7].mxu0 }
 0x1e8   : > { %v546_v33 = vpop.f32.mrb[8].mxu0 }
 0x1e9   : > { %v547_v34 = vadd.f32 %v546_v33, %v460_v20  ;;  %v1640_v35 = vpop.f32.mrb[9].mxu0 }
 0x1ea   : > { %v549_v36 = vpop.f32.mrb[10].mxu0 }
 0x1eb   : > { %v550_v37 = vadd.f32 %v549_v36, %v463_v22  ;;  %v1641_v38 = vpop.f32.mrb[11].mxu0 }
 0x1f0   : > { %v554_v39 = vpop.f32.mrb[12].mxu0 }
 0x1f1   : > { %v555_v40 = vadd.f32 %v554_v39, %v468_v23  ;;  %v1644_v41 = vpop.f32.mrb[13].mxu0 }
 0x1f2   : > { %v557_v42 = vpop.f32.mrb[14].mxu0 }
 0x1f3   : > { %v1645_v43 = vpop.f32.mrb[15].mxu0 }
 0x239   : > { %v626_v44 = vpop.f32.mrb[12].mxu1  ;;  %v718_v45 = vpop.f32.mrb[16].mxu0 }
 0x23a   : > { %v648_v46 = vadd.f32 %v626_v44, %v539_v28  ;;  %v1650_v47 = vpop.f32.mrb[13].mxu1  ;;  %v1664_v48 = vpop.f32.mrb[17].mxu0 }
 0x23b   : > { %v629_v49 = vpop.f32.mrb[14].mxu1  ;;  %v721_v50 = vpop.f32.mrb[18].mxu0 }
 0x23c   : > { %v649_v51 = vadd.f32 %v629_v49, %v542_v31  ;;  %v740_v52 = vadd.f32 %v718_v45, %v648_v46  ;;  %v1651_v53 = vpop.f32.mrb[15].mxu1  ;;  %v1665_v54 = vpop.f32.mrb[19].mxu0 }
 0x23e   : > { %v741_v55 = vadd.f32 %v721_v50, %v649_v51 }
 0x241   : > { %v634_v56 = vpop.f32.mrb[16].mxu1  ;;  %v726_v57 = vpop.f32.mrb[20].mxu0 }
 0x242   : > { %v650_v58 = vadd.f32 %v634_v56, %v547_v34  ;;  %v1654_v59 = vpop.f32.mrb[17].mxu1  ;;  %v1668_v60 = vpop.f32.mrb[21].mxu0 }
 0x243   : > { %v637_v61 = vpop.f32.mrb[18].mxu1  ;;  %v729_v62 = vpop.f32.mrb[22].mxu0 }
 0x244   : > { %v651_v63 = vadd.f32 %v637_v61, %v550_v37  ;;  %v742_v1 = vadd.f32 %v726_v57, %v650_v58  ;;  %v1655_v2 = vpop.f32.mrb[19].mxu1  ;;  %v1669_v3 = vpop.f32.mrb[23].mxu0 }
 0x246   : > { %v743_v4 = vadd.f32 %v729_v62, %v651_v63 }
 0x249   : > { %v642_v5 = vpop.f32.mrb[20].mxu1  ;;  %v734_v6 = vpop.f32.mrb[24].mxu0 }
 0x24a   : > { %v652_v7 = vadd.f32 %v642_v5, %v555_v40  ;;  %v1658_v8 = vpop.f32.mrb[21].mxu1  ;;  %v1672_v9 = vpop.f32.mrb[25].mxu0 }
 0x24b   : > { %v645_v10 = vpop.f32.mrb[22].mxu1  ;;  %v737_v11 = vpop.f32.mrb[26].mxu0 }
 0x24c   : > { %v744_v12 = vadd.f32 %v734_v6, %v652_v7  ;;  %v1659_v13 = vpop.f32.mrb[23].mxu1  ;;  %v1673_v14 = vpop.f32.mrb[27].mxu0 }
 0x251   : > { %v810_v15 = vpop.f32.mrb[24].mxu1  ;;  %v902_v16 = vpop.f32.mrb[28].mxu0 }
 0x252   : > { %v832_v17 = vadd.f32 %v810_v15, %v740_v52  ;;  %v1678_v18 = vpop.f32.mrb[25].mxu1  ;;  %v1692_v19 = vpop.f32.mrb[29].mxu0 }
 0x253   : > { %v813_v20 = vpop.f32.mrb[26].mxu1  ;;  %v905_v21 = vpop.f32.mrb[30].mxu0 }
 0x254   : > { %v833_v22 = vadd.f32 %v813_v20, %v741_v55  ;;  %v924_v0 = vadd.f32 %v902_v16, %v832_v17  ;;  %v1679_v23 = vpop.f32.mrb[27].mxu1  ;;  %v1693_v24 = vpop.f32.mrb[31].mxu0 }
 0x255   : > { %v1305_v19 = vpop.permute.xlu1 %1304 }
 0x256   : > { %v925_v25 = vadd.f32 %v905_v21, %v833_v22 }
 0x259   : > { %v818_v26 = vpop.f32.mrb[28].mxu1  ;;  %v910_v27 = vpop.f32.mrb[32].mxu0 }
 0x25a   : > { %v834_v28 = vadd.f32 %v818_v26, %v742_v1  ;;  %v1682_v29 = vpop.f32.mrb[29].mxu1  ;;  %v1696_v30 = vpop.f32.mrb[33].mxu0 }
 0x25b   : > { %v821_v31 = vpop.f32.mrb[30].mxu1  ;;  %v913_v32 = vpop.f32.mrb[34].mxu0 }
 0x25c   : > { %v835_v33 = vadd.f32 %v821_v31, %v743_v4  ;;  %v926_v34 = vadd.f32 %v910_v27, %v834_v28  ;;  %v1683_v35 = vpop.f32.mrb[31].mxu1  ;;  %v1697_v36 = vpop.f32.mrb[35].mxu0 }
 0x25d   : > { %v1310_v30 = vpop.permute.xlu0 %1309 }
 0x25e   : > { %v927_v37 = vadd.f32 %v913_v32, %v835_v33  ;;  %v1315_v33 = vpop.permute.xlu1 %1314 }
 0x261   : > { %v826_v38 = vpop.f32.mrb[32].mxu1  ;;  %v918_v39 = vpop.f32.mrb[36].mxu0 }
 0x262   : > { %v836_v40 = vadd.f32 %v826_v38, %v744_v12  ;;  %v1686_v41 = vpop.f32.mrb[33].mxu1  ;;  %v1700_v42 = vpop.f32.mrb[37].mxu0 }
 0x263   : > { %v829_v43 = vpop.f32.mrb[34].mxu1  ;;  %v921_v44 = vpop.f32.mrb[38].mxu0 }
 0x264   : > { %v928_v45 = vadd.f32 %v918_v39, %v836_v40  ;;  %v1687_v46 = vpop.f32.mrb[35].mxu1  ;;  %v1701_v47 = vpop.f32.mrb[39].mxu0 }
 0x269   : > { %v994_v48 = vpop.f32.mrb[36].mxu1  ;;  %v1086_v49 = vpop.f32.mrb[40].mxu0 }
 0x26a   : > { %v1016_v50 = vadd.f32 %v994_v48, %v924_v0  ;;  %v1706_v51 = vpop.f32.mrb[37].mxu1  ;;  %v1720_v52 = vpop.f32.mrb[41].mxu0 }
 0x26b   : > { %v997_v53 = vpop.f32.mrb[38].mxu1  ;;  %v1089_v54 = vpop.f32.mrb[42].mxu0 }
 0x26c   : > { %v1017_v55 = vadd.f32 %v997_v53, %v925_v25  ;;  %v1108_v56 = vadd.f32 %v1086_v49, %v1016_v50  ;;  %v1707_v57 = vpop.f32.mrb[39].mxu1  ;;  %v1721_v58 = vpop.f32.mrb[43].mxu0 }
 0x26d   : > { %v1320_v50 = vpop.permute.xlu1 %1319 }
 0x26e   : > { %v1109_v59 = vadd.f32 %v1089_v54, %v1017_v55 }
 0x271   : > { %v1002_v60 = vpop.f32.mrb[40].mxu1  ;;  %v1094_v61 = vpop.f32.mrb[44].mxu0 }
 0x272   : > { %v1018_v62 = vadd.f32 %v1002_v60, %v926_v34  ;;  %v1710_v63 = vpop.f32.mrb[41].mxu1  ;;  %v1724_v1 = vpop.f32.mrb[45].mxu0 }
 0x273   : > { %v1005_v2 = vpop.f32.mrb[42].mxu1  ;;  %v1097_v3 = vpop.f32.mrb[46].mxu0 }
 0x274   : > { %v1019_v4 = vadd.f32 %v1005_v2, %v927_v37  ;;  %v1110_v5 = vadd.f32 %v1094_v61, %v1018_v62  ;;  %v1711_v6 = vpop.f32.mrb[43].mxu1  ;;  %v1725_v7 = vpop.f32.mrb[47].mxu0 }
 0x275   : > { %v1325_v1 = vpop.permute.xlu0 %1324 }
 0x276   : > { %v1111_v8 = vadd.f32 %v1097_v3, %v1019_v4 }
 0x279   : > { %v1010_v9 = vpop.f32.mrb[44].mxu1  ;;  %v1102_v10 = vpop.f32.mrb[48].mxu0 }
 0x27a   : > { %v1020_v11 = vadd.f32 %v1010_v9, %v928_v45  ;;  %v1714_v12 = vpop.f32.mrb[45].mxu1  ;;  %v1728_v13 = vpop.f32.mrb[49].mxu0 }
 0x27b   : > { %v1013_v14 = vpop.f32.mrb[46].mxu1  ;;  %v1105_v15 = vpop.f32.mrb[50].mxu0 }
 0x27c   : > { %v1112_v16 = vadd.f32 %v1102_v10, %v1020_v11  ;;  %v1715_v17 = vpop.f32.mrb[47].mxu1  ;;  %v1729_v18 = vpop.f32.mrb[51].mxu0 }
 0x281   : > { %v1178_v20 = vpop.f32.mrb[48].mxu1  ;;  %v1270_v21 = vpop.f32.mrb[52].mxu0 }
 0x282   : > { %v1200_v22 = vadd.f32 %v1178_v20, %v1108_v56  ;;  %v1734_v0 = vpop.f32.mrb[49].mxu1  ;;  %v1748_v23 = vpop.f32.mrb[53].mxu0 }
 0x283   : > { %v1181_v24 = vpop.f32.mrb[50].mxu1  ;;  %v1273_v25 = vpop.f32.mrb[54].mxu0 }
 0x284   : > { %v1201_v26 = vadd.f32 %v1181_v24, %v1109_v59  ;;  %v1292_v27 = vadd.f32 %v1270_v21, %v1200_v22  ;;  %v1735_v28 = vpop.f32.mrb[51].mxu1  ;;  %v1749_v29 = vpop.f32.mrb[55].mxu0 }
 0x286   : > { %v1327_v31 = vadd.f32 %v1305_v19, %v1292_v27  ;;  %v1293_v32 = vadd.f32 %v1273_v25, %v1201_v26 }
 0x288   : > { %v1332_v34 = vmax.f32 %v1327_v31, 0.0  ;;  %v1328_v35 = vadd.f32 %v1310_v30, %v1293_v32 }
 0x289   : > { %v1186_v36 = vpop.f32.mrb[52].mxu1  ;;  %v1278_v37 = vpop.f32.mrb[56].mxu0 }
 0x28a   : > { %v1202_v38 = vadd.f32 %v1186_v36, %v1110_v5  ;;  %v1738_v39 = vpop.f32.mrb[53].mxu1  ;;  %1362 = vrot.lane.b32.xlu0 %v1332_v34, %s1831_s16  ;;  %1342 = vrot.lane.b32.xlu1 %v1332_v34, %s1826_s25  ;;  %v1752_v40 = vpop.f32.mrb[57].mxu0  ;;  %v1333_v43 = vmax.f32 %v1328_v35, 0.0 }
 0x28b   : > { %v1189_v41 = vpop.f32.mrb[54].mxu1  ;;  %v1281_v42 = vpop.f32.mrb[58].mxu0 }
 0x28c   : > { %v1203_v44 = vadd.f32 %v1189_v41, %v1111_v8  ;;  %v1294_v45 = vadd.f32 %v1278_v37, %v1202_v38  ;;  %v1739_v46 = vpop.f32.mrb[55].mxu1  ;;  %v1753_v47 = vpop.f32.mrb[59].mxu0 }
 0x28e   : > { %v1329_v48 = vadd.f32 %v1315_v33, %v1294_v45  ;;  %v1295_v49 = vadd.f32 %v1281_v42, %v1203_v44  ;;  %1364 = vrot.lane.b32.xlu1 %v1333_v43, %s1831_s16  ;;  %1344 = vrot.lane.b32.xlu0 %v1333_v43, %s1826_s25 }
 0x290   : > { %v1334_v51 = vmax.f32 %v1329_v48, 0.0  ;;  %v1330_v52 = vadd.f32 %v1320_v50, %v1295_v49 }
 0x291   : > { %v1194_v53 = vpop.f32.mrb[56].mxu1  ;;  %v1286_v54 = vpop.f32.mrb[60].mxu0 }
 0x292   : > { %v1204_v55 = vadd.f32 %v1194_v53, %v1112_v16  ;;  %1366 = vrot.lane.b32.xlu0 %v1334_v51, %s1831_s16  ;;  %1346 = vrot.lane.b32.xlu1 %v1334_v51, %s1826_s25  ;;  %v1742_v56 = vpop.f32.mrb[57].mxu1  ;;  %v1756_v57 = vpop.f32.mrb[61].mxu0  ;;  %v1335_v60 = vmax.f32 %v1330_v52, 0.0 }
 0x293   : > { %v1197_v58 = vpop.f32.mrb[58].mxu1  ;;  %v1289_v59 = vpop.f32.mrb[62].mxu0 }
 0x294   : > { %v1296_v61 = vadd.f32 %v1286_v54, %v1204_v55  ;;  %v1743_v62 = vpop.f32.mrb[59].mxu1  ;;  %v1757_v63 = vpop.f32.mrb[63].mxu0 }
 0x296   : > { %v1331_v2 = vadd.f32 %v1325_v1, %v1296_v61  ;;  %1348 = vrot.lane.b32.xlu0 %v1335_v60, %s1826_s25 }
 0x298   : > { %v1336_v3 = vmax.f32 %v1331_v2, 0.0 }
 0x29a   : > { %1370 = vrot.lane.b32.xlu0 %v1336_v3, %s1831_s16  ;;  %1350 = vrot.lane.b32.xlu1 %v1336_v3, %s1826_s25 }
 0x29e   : > { %1368 = vrot.lane.b32.xlu1 %v1335_v60, %s1831_s16 }
 0x2fc   : > { %v1363_v4 = vpop.permute.xlu0 %1362  ;;  %v1343_v5 = vpop.permute.xlu1 %1342 }
 0x2fd   : > { %1357 = vst.msk [vmem:[%s277_s20] sm:$0xff] %vm408_vm8, %v1343_v5  ;;  %1561 = vst.msk [vmem:[%s277_s20 + $0x28] sm:$0xff] %vm408_vm8, %v1363_v4 }
 0x300   : > { %v1365_v6 = vpop.permute.xlu1 %1364  ;;  %v1345_v7 = vpop.permute.xlu0 %1344 }
 0x301   : > { %1358 = vst.msk [vmem:[%s277_s20 + $0x8] sm:$0xff] %vm408_vm8, %v1345_v7  ;;  %1562 = vst.msk [vmem:[%s277_s20 + $0x30] sm:$0xff] %vm408_vm8, %v1365_v6 }
 0x304   : > { %v1367_v8 = vpop.permute.xlu0 %1366  ;;  %v1347_v9 = vpop.permute.xlu1 %1346 }
 0x305   : > { %1359 = vst.msk [vmem:[%s277_s20 + $0x10] sm:$0xff] %vm408_vm8, %v1347_v9  ;;  %1563 = vst.msk [vmem:[%s277_s20 + $0x38] sm:$0xff] %vm408_vm8, %v1367_v8 }
 0x308   : > { %v1349_v10 = vpop.permute.xlu0 %1348 }
 0x309   : > { %1360 = vst.msk [vmem:[%s277_s20 + $0x18] sm:$0xff] %vm408_vm8, %v1349_v10 }
 0x30c   : > { %v1371_v11 = vpop.permute.xlu0 %1370  ;;  %v1351_v12 = vpop.permute.xlu1 %1350 }
 0x30d   : > { %1361 = vst.msk [vmem:[%s277_s20 + $0x20] sm:$0xff] %vm408_vm8, %v1351_v12  ;;  %1565 = vst.msk [vmem:[%s277_s20 + $0x48] sm:$0xff] %vm408_vm8, %v1371_v11 }
 0x310   : > { %v1369_v13 = vpop.permute.xlu1 %1368 }
 0x311   : > { %1564 = vst.msk [vmem:[%s277_s20 + $0x40] sm:$0xff] %vm408_vm8, %v1369_v13 }
 0x312 PF: > { %s17_s24 = sadd.s32 1, %s1818_s24  }
 0x313   : > { %p14_p7 = scmp.ge.s32.totalorder %s17_s24, 4  }
 0x315   :  { %16 = sbr.rel (!%p14_p7) target bundleno = 1 (0x1), region = 87 }

// kernel: _lambda_.2
= control target key start
LH: loop header
LB: loop body
LE: loop exit
PB: predicated region body
PF: predicated region fallthrough
CT: control target
= control target key end

     0   :  { %s2029_s27 = smov 0   ;;  %s2361_s0 = inlined_call_operand.vmem [shape: bf16[2,8,56], index: 0, kind: input, shape index: {}]   ;;  %s2362_s1 = inlined_call_operand.vmem [shape: f32[1,56], index: 1, kind: input, shape index: {}]   ;;  %s2363_s2 = inlined_call_operand.vmem [shape: bf16[16,8], index: 2, kind: input, shape index: {}]   ;;  %s2364_s3 = inlined_call_operand.vmem [shape: f32[16,1], index: 3, kind: input, shape index: {}]   ;;  %s2365_s4 = inlined_call_operand.vmem [shape: bf16[9,40,16], index: 4, kind: input, shape index: {}]   ;;  %s2366_s5 = inlined_call_operand.vmem [shape: bf16[40,8], index: 5, kind: input, shape index: {}]   ;;  %s2367_s6 = inlined_call_operand.vmem [shape: f32[40,1], index: 6, kind: input, shape index: {}]   ;;  %s2368_s7 = inlined_call_operand.vmem [shape: f32[2,40,1], index: 7, kind: output, shape index: {0}]   ;;  %s2369_s8 = inlined_call_operand.vmem [shape: f32[2,40,1], index: 8, kind: output, shape index: {1}]  }
   0x1 LB: > { %s1596_s28 = sadd.s32 4294967295, %s1969_s27   ;;  %p1600_p0 = scmp.ge.s32.totalorder %s1969_s27, 1  ;;  %s1969_s27 = sphi %s2029_s27, %s19_s27  }
   0x2   : > { %p264_p1 = scmp.lt.s32.totalorder %s1969_s27, 3 }
   0x4   : > { %p265_p2 = pnand %p1600_p0, %p264_p1 }
   0x5   : > { %p302_p3 = scmp.lt.s32.totalorder (!%p265_p2), %s1596_s28, 1  ;;  %v1971_v0 = vmov (!%p265_p2), 0.0   ;;  %vm1972_vm0 = vmmov (!%p265_p2), 0   ;;  %s1604_s29 = sshll.u32 (!%p265_p2), %s1596_s28, 1  ;;  %v324_v1 = vlaneseq (!%p265_p2)  ;;  %v1973_v2 = vmov (!%p265_p2), 0   ;;  %v336_v3 = vld [vmem:[%s2364_s3] sm:$0xff] (!%p265_p2) }
   0x6   : > { %268 = sbr.rel (%p265_p2) target bundleno = 1043 (0x413), region = 48  ;;  %1762 = vmatprep.subr.bf16.mxu0 (!%p265_p2), %v1971_v0  ;;  %1764 = vmatprep.mubr.msk.bf16.mxu0 (!%p265_p2), %vm1972_vm0, %v1971_v0  ;;  %s319_s10 = ssub.s32 (!%p265_p2), 4, %s1604_s29  ;;  %vm357_vm1 = vcmask (!%p265_p2), 1043456   ;;  %v337_v4 = vld [vmem:[%s2364_s3 + $0x8] sm:$0xff] (!%p265_p2)  ;;  %v1932_v5 = vld [vmem:[%s2363_s2] sm:$0xff] (!%p265_p2)   ;;  %vm353_vm2 = vcmask (!%p265_p2), 64512  }
   0x7   : > { %1930 = vset.pattern.permute.xlu1 (!%p265_p2), %v1973_v2  ;;  %1768 = vmatprep.subr.bf16.mxu1 (!%p265_p2), %v1971_v0  ;;  %p320_p4 = scmp.gt.s32.totalorder (!%p265_p2), %s319_s10, 0  ;;  %p1605_p5 = scmp.lt.s32.totalorder (!%p265_p2), %s319_s10, 2  ;;  %v2060_v7 = vand.u32 (!%p265_p2), 127, %v324_v1  ;;  %v2065_v8 = vld [vmem:[%s2362_s1] sm:$0x1] (!%p265_p2)  ;;  %v2070_v10 = vshrl.u32 (!%p265_p2), %v324_v1, 7 }
   0x8   : > { %340 = vperm.xlu1 (!%p265_p2), %1930, %v336_v3   ;;  %1770 = vmatprep.mubr.msk.bf16.mxu1 (!%p265_p2), %vm1972_vm0, %v1971_v0  ;;  %vm327_vm3 = vcmp.gt.f32.partialorder (!%p265_p2), %v2065_v8, 0.5  ;;  %s1974_s23 = smov (!%p265_p2), 127   ;;  %s1975_s24 = smov (!%p265_p2), 126   ;;  %v1933_v34 = vld [vmem:[%s2365_s4] sm:$0xff] (!%p265_p2)   ;;  %vm445_vm8 = vcmask (!%p265_p2), 130048   ;;  %v1935_v35 = vld [vmem:[%s2365_s4 + $0x8] sm:$0xff] (!%p265_p2)  }
   0x9   : > { %1931 = vset.pattern.permute.xlu0 (!%p265_p2), %v1973_v2  ;;  %v405_v11 = vsub.s32 (!%p265_p2), 0, %v2070_v10  ;;  %s1976_s25 = smov (!%p265_p2), 125   ;;  %s1977_s30 = smov (!%p265_p2), 124   ;;  %v1334_v36 = vld [vmem:[%s2367_s6] sm:$0xff] (!%p265_p2)  ;;  %v1937_v37 = vld [vmem:[%s2365_s4 + $0x10] ss:$0 sps:$4 sm:$0xff] (!%p265_p2)  }
   0xa   : > { %s1978_s12 = smov (!%p265_p2), 122   ;;  %s1979_s13 = smov (!%p265_p2), 123   ;;  %v1336_v38 = vld [vmem:[%s2367_s6 + $0x10] sm:$0xff] (!%p265_p2)  ;;  %v1337_v39 = vld [vmem:[%s2367_s6 + $0x18] sm:$0xff] (!%p265_p2)  ;;  %v1934_v42 = vld [vmem:[%s2366_s5] sm:$0xff] (!%p265_p2)   ;;  %vm1441_vm13 = vcmask (!%p265_p2), 392192  }
   0xb   : > { %s1980_s14 = smov (!%p265_p2), 120   ;;  %s1981_s15 = smov (!%p265_p2), 121   ;;  %v1936_v43 = vld [vmem:[%s2366_s5 + $0x8] sm:$0xff] (!%p265_p2)   ;;  %v1938_v44 = vld [vmem:[%s2366_s5 + $0x10] ss:$0 sps:$4 sm:$0xff] (!%p265_p2)   ;;  %v1338_v46 = vld [vmem:[%s2367_s6 + $0x20] sm:$0xff] (!%p265_p2) }
   0xc   : > { %345 = vperm.xlu1 (!%p265_p2), %1930, %v337_v4   ;;  %v1335_v45 = vld [vmem:[%s2367_s6 + $0x8] sm:$0xff] (!%p265_p2)  ;;  %v1940_v50 = vld [vmem:[%s2365_s4 + $0x14] sm:$0xff] (!%p265_p2)   ;;  %v1942_v54 = vld [vmem:[%s2365_s4 + $0x1c] sm:$0xff] (!%p265_p2)   ;;  %vm1457_vm14 = vcmask (!%p265_p2), 7168  }
   0xd   : > { %s2373_s28 = smov (!%p302_p3, %s1596_s28), 1  ;;  %s2375_s10 = smov (!%p320_p4, %s319_s10), 0  ;;  %v1939_v49 = vld [vmem:[%s2365_s4 + $0x28] sm:$0xff]   ;;  %v1941_v53 = vld [vmem:[%s2365_s4 + $0x30] sm:$0xff]   ;;  %v1943_v55 = vld [vmem:[%s2365_s4 + $0x24] ss:$0 sps:$4 sm:$0xff]  }
   0xe   : > { %s1601_s11 = sshll.u32 %s2373_s28, 2  ;;  %s2377_s10 = smov (!%p1605_p5, %s2375_s10), 2  ;;  %v1944_v56 = vld [vmem:[%s2365_s4 + $0x38] ss:$0 sps:$4 sm:$0xff]   ;;  %v1945_v57 = vld [vmem:[%s2365_s4 + $0x3c] sm:$0xff]   ;;  %v1946_v58 = vld [vmem:[%s2365_s4 + $0x50] sm:$0xff]  }
   0xf   : > { %s305_s16 = scalar_lea.vmem %s2361_s0, %s1601_s11  ;;  %s328_s21 = smul.u32 24, %s2377_s10  ;;  %v1947_v61 = vld [vmem:[%s2365_s4 + $0x44] sm:$0xff]   ;;  %v1948_v62 = vld [vmem:[%s2365_s4 + $0x58] sm:$0xff]   ;;  %v1949_v63 = vld [vmem:[%s2365_s4 + $0x4c] ss:$0 sps:$4 sm:$0xff]  }
  0x10   : > { %v333_v6 = vld [vmem:[%s305_s16] sm:$0xf]  ;;  %v1951_v3 = vld [vmem:[%s2365_s4 + $0x64] sm:$0xff]   ;;  %v1952_v4 = vld [vmem:[%s2365_s4 + $0x78] sm:$0xff]   ;;  %s1908_s10 = smul.u32 40, %s2373_s28 }
  0x11   : > { %v359_v9 = vsel %vm357_vm1, %v333_v6, 0  ;;  %s329_s22 = sadd.s32 4, %s328_s21  ;;  %v1950_v1 = vld [vmem:[%s2365_s4 + $0x60] ss:$0 sps:$4 sm:$0xff]   ;;  %v1957_v15 = vld [vmem:[%s2365_s4 + $0x8c] sm:$0xff]  }
  0x12   : > { %1763 = vmatpush3.bf16.msra.mxu0 %v359_v9  ;;  %v330_v12 = vstv %s329_s22  ;;  %v1953_v9 = vld [vmem:[%s2365_s4 + $0x6c] sm:$0xff]   ;;  %s315_s18 = scalar_lea.vmem %s2369_s8, %s1908_s10 }
  0x13   : > { %1782 = vmatprep.subr.bf16.mxu0 %v1971_v0  ;;  %vm331_vm4 = vcmp.lt.s32.totalorder %v2060_v7, %v330_v12  ;;  %v1954_v12 = vld [vmem:[%s2365_s4 + $0x80] sm:$0xff]  }
  0x14   : > { %vm332_vm5 = vmand %vm327_vm3, %vm331_vm4 }
  0x15   : > { %1765 = vmatmul.mubr.msk.bf16.vlgmr.msra.gmra.mrb[0].mxu0 %vm353_vm2, %v1932_v5  ;;  %v402_v13 = vsel %vm332_vm5, 1, %v1973_v2 }
  0x16   : > { %1784 = vmatprep.mubr.msk.bf16.mxu0 %vm1972_vm0, %v1971_v0  ;;  %v406_v14 = vrot.slane %v402_v13, %v405_v11  ;;  %v1955_v13 = vld [vmem:[%s2365_s4 + $0x74] ss:$0 sps:$4 sm:$0xff]  }
  0x18   : > { %vm407_vm6 = vcmp.eq.s32.totalorder %v406_v14, 1  ;;  %v1956_v14 = vld [vmem:[%s2365_s4 + $0x88] ss:$0 sps:$4 sm:$0xff]  }
  0x19   : > { %vm2089_vm7 = vmpackc.low %vm407_vm6, %vm407_vm6 }
  0x1a   : > { %v412_v16 = vsel %vm2089_vm7, %v333_v6, 4284677986 }
  0x1b   : > { %414 = vrot.lane.b32.xlu0 %v412_v16, %s1974_s23 }
  0x1f   : > { %418 = vrot.lane.b32.xlu0 %v412_v16, %s1975_s24 }
  0x87   : > { %v341_v22 = vpop.permute.xlu1 %340 }
  0x8b   : > { %v346_v26 = vpop.permute.xlu1 %345 }
  0x8d   : > { %v415_v17 = vpop.permute.xlu0 %414 }
  0x8e   : > { %v417_v18 = vmax.bf16 %v415_v17, %v412_v16  ;;  %v1958_v16 = vld [vmem:[%s2365_s4 + $0xa0] sm:$0xff]   ;;  %v1959_v17 = vld [vmem:[%s2365_s4 + $0x94] sm:$0xff]  }
  0x91   : > { %v419_v19 = vpop.permute.xlu0 %418 }
  0x92   : > { %v421_v20 = vmax.bf16 %v419_v19, %v417_v18  ;;  %v1960_v18 = vld [vmem:[%s2365_s4 + $0xa8] sm:$0xff]   ;;  %v1961_v19 = vld [vmem:[%s2365_s4 + $0x9c] ss:$0 sps:$4 sm:$0xff]  }
  0x94   : > { %v1624_v21 = vcombine.low %v421_v20, %v421_v20  ;;  %v1962_v20 = vld [vmem:[%s2365_s4 + $0xb0] ss:$0 sps:$4 sm:$0xff]  }
  0x96   : > { %527 = vrot.lane.b32.xlu0 %v1624_v21, %s1976_s25 }
  0xe8   : > { %v395_v23 = vpop.f32.mrb[0].mxu0 }
  0xe9   : > { %v396_v24 = vadd.f32 %v395_v23, %v341_v22  ;;  %v1766_v25 = vpop.f32.mrb[1].mxu0 }
  0xea   : > { %v398_v27 = vpop.f32.mrb[2].mxu0 }
  0xeb   : > { %v399_v28 = vadd.f32 %v398_v27, %v346_v26  ;;  %v1767_v29 = vpop.f32.mrb[3].mxu0  ;;  %v408_v30 = vsel %vm407_vm6, %v396_v24, 0.0 }
  0xed   : > { %v409_v31 = vsel %vm407_vm6, %v399_v28, 0.0  ;;  %v1616_v32 = vpack.c.bf16 %v399_v28, %v396_v24 }
  0xee   : > { %v410_v33 = vpack.c.bf16 %v409_v31, %v408_v30 }
  0xef   : > { %1769 = vmatpush3.bf16.msk.msra.mxu1 %vm2089_vm7, %v1616_v32 }
  0xf0   : > { %709 = vrot.lane.b32.xlu0 %v410_v33, %s1975_s24  ;;  %617 = vrot.lane.b32.xlu1 %v410_v33, %s1974_s23 }
  0xf1   : > { %1796 = vmatprep.subr.bf16.mxu1 %v1971_v0 }
  0xf2   : > { %1771 = vmatmul.mubr.msk.bf16.vlgmr.msra.gmra.mrb[0].mxu1 %vm445_vm8, %v1933_v34 }
  0xf3   : > { %1774 = vmatprep.mubr.msk.bf16.mxu1 %vm1972_vm0, %v1971_v0 }
  0xf4   : > { %893 = vrot.lane.b32.xlu0 %v410_v33, %s1977_s30  ;;  %801 = vrot.lane.b32.xlu1 %v410_v33, %s1976_s25 }
  0xf8   : > { %1077 = vrot.lane.b32.xlu0 %v410_v33, %s1978_s12  ;;  %985 = vrot.lane.b32.xlu1 %v410_v33, %s1979_s13 }
  0xfa   : > { %1775 = vmatmul.mubr.msk.bf16.gmra.mrb[4].mxu1 %vm445_vm8, %v1935_v35 }
  0xfb   : > { %1778 = vmatprep.mubr.msk.bf16.mxu1 %vm1972_vm0, %v1971_v0 }
  0xfc   : > { %1261 = vrot.lane.b32.xlu0 %v410_v33, %s1980_s14  ;;  %1169 = vrot.lane.b32.xlu1 %v410_v33, %s1981_s15  ;;  %s1983_s14 = smov 4   ;;  %s310_s15 = scalar_lea.vmem %s2368_s7, %s1908_s10 }
 0x100   : > { %1341 = vperm.xlu1 %1930, %v1334_v36   ;;  %1346 = vperm.xlu0 %1931, %v1335_v45  }
 0x102   : > { %1779 = vmatmul.mubr.msk.bf16.gmra.mrb[8].mxu1 %vm445_vm8, %v1937_v37 }
 0x103   : > { %1798 = vmatprep.mubr.msk.bf16.mxu1 %vm1972_vm0, %v1971_v0 }
 0x104   : > { %1351 = vperm.xlu1 %1930, %v1336_v38   ;;  %1361 = vperm.xlu0 %1931, %v1338_v46  }
 0x108   : > { %1356 = vperm.xlu1 %1930, %v1337_v39   ;;  %v528_v40 = vpop.permute.xlu0 %527 }
 0x109   : > { %v539_v41 = vsel %vm357_vm1, %v528_v40, 0 }
 0x10a   : > { %1783 = vmatpush3.bf16.msra.mxu0 %v539_v41 }
 0x10b   : > { %1810 = vmatprep.subr.bf16.mxu0 %v1971_v0 }
 0x10d   : > { %1785 = vmatmul.mubr.msk.bf16.vlgmr.msra.gmra.mrb[4].mxu0 %vm353_vm2, %v1934_v42 }
 0x10e   : > { %1788 = vmatprep.mubr.msk.bf16.mxu0 %vm1972_vm0, %v1971_v0 }
 0x115   : > { %1789 = vmatmul.mubr.msk.bf16.gmra.mrb[8].mxu0 %vm353_vm2, %v1936_v43 }
 0x116   : > { %1792 = vmatprep.mubr.msk.bf16.mxu0 %vm1972_vm0, %v1971_v0 }
 0x11d   : > { %1793 = vmatmul.mubr.msk.bf16.gmra.mrb[12].mxu0 %vm353_vm2, %v1938_v44 }
 0x11e   : > { %1812 = vmatprep.mubr.msk.bf16.mxu0 %vm1972_vm0, %v1971_v0 }
 0x162   : > { %v710_v47 = vpop.permute.xlu0 %709  ;;  %v618_v48 = vpop.permute.xlu1 %617 }
 0x163   : > { %1797 = vmatpush3.bf16.msra.mxu1 %v618_v48  ;;  %1811 = vmatpush3.bf16.msra.mxu0 %v710_v47 }
 0x164   : > { %1838 = vmatprep.subr.bf16.mxu0 %v1971_v0  ;;  %1824 = vmatprep.subr.bf16.mxu1 %v1971_v0 }
 0x166   : > { %1813 = vmatmul.mubr.msk.bf16.vlgmr.msra.gmra.mrb[16].mxu0 %vm445_vm8, %v1939_v49  ;;  %v894_v51 = vpop.permute.xlu0 %893  ;;  %1799 = vmatmul.mubr.msk.bf16.vlgmr.msra.gmra.mrb[12].mxu1 %vm445_vm8, %v1940_v50  ;;  %v802_v52 = vpop.permute.xlu1 %801  ;;  %v1982_v49 = vmov 1966171168  }
 0x167   : > { %1825 = vmatpush3.bf16.msra.mxu1 %v802_v52  ;;  %1839 = vmatpush3.bf16.msra.mxu0 %v894_v51  ;;  %v1373_v50 = vunpack.c.l.s4 %v1982_v49  ;;  %v1369_v52 = vstv %s328_s21 }
 0x168   : > { %1802 = vmatprep.mubr.msk.bf16.mxu1 %vm1972_vm0, %v1971_v0  ;;  %1816 = vmatprep.mubr.msk.bf16.mxu0 %vm1972_vm0, %v1971_v0  ;;  %vm1370_vm9 = vcmp.lt.s32.totalorder %v2060_v7, %v1369_v52 }
 0x169   : > { %1852 = vmatprep.subr.bf16.mxu1 %v1971_v0  ;;  %1866 = vmatprep.subr.bf16.mxu0 %v1971_v0  ;;  %v1374_v51 = vunpack.c.0.s8 %v1373_v50 }
 0x16a   : > { %v1078_v59 = vpop.permute.xlu0 %1077  ;;  %v986_v60 = vpop.permute.xlu1 %985 }
 0x16e   : > { %1817 = vmatmul.mubr.msk.bf16.gmra.mrb[20].mxu0 %vm445_vm8, %v1941_v53  ;;  %1803 = vmatmul.mubr.msk.bf16.gmra.mrb[16].mxu1 %vm445_vm8, %v1942_v54  ;;  %v1262_v5 = vpop.permute.xlu0 %1261  ;;  %v1170_v6 = vpop.permute.xlu1 %1169  ;;  %v1377_v53 = vsub.s32 %v1374_v51, %v2070_v10  ;;  %v1371_v54 = vsel %vm1370_vm9, 1, %v1973_v2 }
 0x16f   : > { %1806 = vmatprep.mubr.msk.bf16.mxu1 %vm1972_vm0, %v1971_v0  ;;  %1820 = vmatprep.mubr.msk.bf16.mxu0 %vm1972_vm0, %v1971_v0 }
 0x176   : > { %1807 = vmatmul.mubr.msk.bf16.gmra.mrb[20].mxu1 %vm445_vm8, %v1943_v55  ;;  %1821 = vmatmul.mubr.msk.bf16.gmra.mrb[24].mxu0 %vm445_vm8, %v1944_v56  ;;  %v1378_v55 = vrot.slane %v1371_v54, %v1377_v53 }
 0x177   : > { %1826 = vmatprep.mubr.msk.bf16.mxu1 %vm1972_vm0, %v1971_v0  ;;  %1840 = vmatprep.mubr.msk.bf16.mxu0 %vm1972_vm0, %v1971_v0 }
 0x178   : > { %v1385_v56 = vrot.slane %v1378_v55, %v1377_v53 }
 0x17a   : > { %1386 = vrot.lane.b32.xlu1 %v1385_v56, %s1983_s14 }
 0x17e   : > { %1827 = vmatmul.mubr.msk.bf16.vlgmr.msra.gmra.mrb[24].mxu1 %vm445_vm8, %v1945_v57  ;;  %1841 = vmatmul.mubr.msk.bf16.vlgmr.msra.gmra.mrb[28].mxu0 %vm445_vm8, %v1946_v58 }
 0x17f   : > { %1853 = vmatpush3.bf16.msra.mxu1 %v986_v60  ;;  %1867 = vmatpush3.bf16.msra.mxu0 %v1078_v59 }
 0x180   : > { %1830 = vmatprep.mubr.msk.bf16.mxu1 %vm1972_vm0, %v1971_v0  ;;  %1844 = vmatprep.mubr.msk.bf16.mxu0 %vm1972_vm0, %v1971_v0 }
 0x181   : > { %1880 = vmatprep.subr.bf16.mxu1 %v1971_v0  ;;  %1894 = vmatprep.subr.bf16.mxu0 %v1971_v0 }
 0x186   : > { %1831 = vmatmul.mubr.msk.bf16.gmra.mrb[28].mxu1 %vm445_vm8, %v1947_v61  ;;  %1845 = vmatmul.mubr.msk.bf16.gmra.mrb[32].mxu0 %vm445_vm8, %v1948_v62 }
 0x187   : > { %1834 = vmatprep.mubr.msk.bf16.mxu1 %vm1972_vm0, %v1971_v0  ;;  %1848 = vmatprep.mubr.msk.bf16.mxu0 %vm1972_vm0, %v1971_v0 }
 0x18e   : > { %1835 = vmatmul.mubr.msk.bf16.gmra.mrb[32].mxu1 %vm445_vm8, %v1949_v63  ;;  %1849 = vmatmul.mubr.msk.bf16.gmra.mrb[36].mxu0 %vm445_vm8, %v1950_v1 }
 0x18f   : > { %1854 = vmatprep.mubr.msk.bf16.mxu1 %vm1972_vm0, %v1971_v0  ;;  %1868 = vmatprep.mubr.msk.bf16.mxu0 %vm1972_vm0, %v1971_v0 }
 0x196   : > { %1855 = vmatmul.mubr.msk.bf16.vlgmr.msra.gmra.mrb[36].mxu1 %vm445_vm8, %v1951_v3  ;;  %1869 = vmatmul.mubr.msk.bf16.vlgmr.msra.gmra.mrb[40].mxu0 %vm445_vm8, %v1952_v4 }
 0x197   : > { %1881 = vmatpush3.bf16.msra.mxu1 %v1170_v6  ;;  %1895 = vmatpush3.bf16.msra.mxu0 %v1262_v5 }
 0x198   : > { %1858 = vmatprep.mubr.msk.bf16.mxu1 %vm1972_vm0, %v1971_v0  ;;  %1872 = vmatprep.mubr.msk.bf16.mxu0 %vm1972_vm0, %v1971_v0 }
 0x19e   : > { %1859 = vmatmul.mubr.msk.bf16.gmra.mrb[40].mxu1 %vm445_vm8, %v1953_v9  ;;  %1873 = vmatmul.mubr.msk.bf16.gmra.mrb[44].mxu0 %vm445_vm8, %v1954_v12 }
 0x19f   : > { %1862 = vmatprep.mubr.msk.bf16.mxu1 %vm1972_vm0, %v1971_v0  ;;  %1876 = vmatprep.mubr.msk.bf16.mxu0 %vm1972_vm0, %v1971_v0 }
 0x1a6   : > { %1863 = vmatmul.mubr.msk.bf16.gmra.mrb[44].mxu1 %vm445_vm8, %v1955_v13  ;;  %1877 = vmatmul.mubr.msk.bf16.gmra.mrb[48].mxu0 %vm445_vm8, %v1956_v14 }
 0x1a7   : > { %1882 = vmatprep.mubr.msk.bf16.mxu1 %vm1972_vm0, %v1971_v0  ;;  %1896 = vmatprep.mubr.msk.bf16.mxu0 %vm1972_vm0, %v1971_v0 }
 0x1ae   : > { %1883 = vmatmul.mubr.msk.bf16.vlgmr.msra.gmra.mrb[48].mxu1 %vm445_vm8, %v1957_v15  ;;  %1897 = vmatmul.mubr.msk.bf16.vlgmr.msra.gmra.mrb[52].mxu0 %vm445_vm8, %v1958_v16 }
 0x1af   : > { %1886 = vmatprep.mubr.msk.bf16.mxu1 %vm1972_vm0, %v1971_v0  ;;  %1900 = vmatprep.mubr.msk.bf16.mxu0 %vm1972_vm0, %v1971_v0 }
 0x1b6   : > { %1887 = vmatmul.mubr.msk.bf16.gmra.mrb[52].mxu1 %vm445_vm8, %v1959_v17  ;;  %1901 = vmatmul.mubr.msk.bf16.gmra.mrb[56].mxu0 %vm445_vm8, %v1960_v18 }
 0x1b7   : > { %1890 = vmatprep.mubr.msk.bf16.mxu1 %vm1972_vm0, %v1971_v0  ;;  %1904 = vmatprep.mubr.msk.bf16.mxu0 %vm1972_vm0, %v1971_v0 }
 0x1be   : > { %1891 = vmatmul.mubr.msk.bf16.gmra.mrb[56].mxu1 %vm445_vm8, %v1961_v19  ;;  %1905 = vmatmul.mubr.msk.bf16.gmra.mrb[60].mxu0 %vm445_vm8, %v1962_v20 }
 0x1c5   : > { %v489_v21 = vpop.f32.mrb[0].mxu1 }
 0x1c6   : > { %v1772_v22 = vpop.f32.mrb[1].mxu1 }
 0x1c7   : > { %v492_v23 = vpop.f32.mrb[2].mxu1 }
 0x1c8   : > { %v1773_v24 = vpop.f32.mrb[3].mxu1 }
 0x1cd   : > { %v497_v25 = vpop.f32.mrb[4].mxu1 }
 0x1ce   : > { %v1776_v26 = vpop.f32.mrb[5].mxu1 }
 0x1cf   : > { %v500_v27 = vpop.f32.mrb[6].mxu1 }
 0x1d0   : > { %v1777_v0 = vpop.f32.mrb[7].mxu1 }
 0x1d5   : > { %v505_v28 = vpop.f32.mrb[8].mxu1 }
 0x1d6   : > { %v1780_v29 = vpop.f32.mrb[9].mxu1 }
 0x1d7   : > { %v508_v30 = vpop.f32.mrb[10].mxu1 }
 0x1d8   : > { %v1781_v31 = vpop.f32.mrb[11].mxu1 }
 0x1e0   : > { %v575_v32 = vpop.f32.mrb[4].mxu0 }
 0x1e1   : > { %v576_v33 = vadd.f32 %v575_v32, %v489_v21  ;;  %v1786_v34 = vpop.f32.mrb[5].mxu0 }
 0x1e2   : > { %v578_v35 = vpop.f32.mrb[6].mxu0 }
 0x1e3   : > { %v579_v36 = vadd.f32 %v578_v35, %v492_v23  ;;  %v1787_v37 = vpop.f32.mrb[7].mxu0 }
 0x1e8   : > { %v583_v38 = vpop.f32.mrb[8].mxu0 }
 0x1e9   : > { %v584_v39 = vadd.f32 %v583_v38, %v497_v25  ;;  %v1790_v40 = vpop.f32.mrb[9].mxu0 }
 0x1ea   : > { %v586_v41 = vpop.f32.mrb[10].mxu0 }
 0x1eb   : > { %v587_v42 = vadd.f32 %v586_v41, %v500_v27  ;;  %v1791_v43 = vpop.f32.mrb[11].mxu0 }
 0x1f0   : > { %v591_v44 = vpop.f32.mrb[12].mxu0 }
 0x1f1   : > { %v592_v45 = vadd.f32 %v591_v44, %v505_v28  ;;  %v1794_v46 = vpop.f32.mrb[13].mxu0 }
 0x1f2   : > { %v594_v47 = vpop.f32.mrb[14].mxu0 }
 0x1f3   : > { %v1795_v48 = vpop.f32.mrb[15].mxu0 }
 0x239   : > { %v663_v57 = vpop.f32.mrb[12].mxu1  ;;  %v755_v58 = vpop.f32.mrb[16].mxu0 }
 0x23a   : > { %v685_v59 = vadd.f32 %v663_v57, %v576_v33  ;;  %v1800_v60 = vpop.f32.mrb[13].mxu1  ;;  %v1814_v61 = vpop.f32.mrb[17].mxu0 }
 0x23b   : > { %v666_v62 = vpop.f32.mrb[14].mxu1  ;;  %v758_v63 = vpop.f32.mrb[18].mxu0 }
 0x23c   : > { %v686_v1 = vadd.f32 %v666_v62, %v579_v36  ;;  %v777_v3 = vadd.f32 %v755_v58, %v685_v59  ;;  %v1801_v4 = vpop.f32.mrb[15].mxu1  ;;  %v1815_v7 = vpop.f32.mrb[19].mxu0 }
 0x23e   : > { %v778_v5 = vadd.f32 %v758_v63, %v686_v1 }
 0x241   : > { %v671_v6 = vpop.f32.mrb[16].mxu1  ;;  %v763_v9 = vpop.f32.mrb[20].mxu0 }
 0x242   : > { %v687_v12 = vadd.f32 %v671_v6, %v584_v39  ;;  %v1804_v13 = vpop.f32.mrb[17].mxu1  ;;  %v1818_v14 = vpop.f32.mrb[21].mxu0 }
 0x243   : > { %v674_v15 = vpop.f32.mrb[18].mxu1  ;;  %v766_v16 = vpop.f32.mrb[22].mxu0 }
 0x244   : > { %v688_v17 = vadd.f32 %v674_v15, %v587_v42  ;;  %v779_v18 = vadd.f32 %v763_v9, %v687_v12  ;;  %v1805_v19 = vpop.f32.mrb[19].mxu1  ;;  %v1819_v20 = vpop.f32.mrb[23].mxu0 }
 0x246   : > { %v780_v21 = vadd.f32 %v766_v16, %v688_v17 }
 0x249   : > { %v679_v22 = vpop.f32.mrb[20].mxu1  ;;  %v771_v23 = vpop.f32.mrb[24].mxu0 }
 0x24a   : > { %v689_v24 = vadd.f32 %v679_v22, %v592_v45  ;;  %v1808_v25 = vpop.f32.mrb[21].mxu1  ;;  %v1822_v26 = vpop.f32.mrb[25].mxu0 }
 0x24b   : > { %v682_v27 = vpop.f32.mrb[22].mxu1  ;;  %v774_v0 = vpop.f32.mrb[26].mxu0 }
 0x24c   : > { %v781_v28 = vadd.f32 %v771_v23, %v689_v24  ;;  %v1809_v29 = vpop.f32.mrb[23].mxu1  ;;  %v1823_v30 = vpop.f32.mrb[27].mxu0 }
 0x251   : > { %v847_v31 = vpop.f32.mrb[24].mxu1  ;;  %v939_v32 = vpop.f32.mrb[28].mxu0 }
 0x252   : > { %v869_v33 = vadd.f32 %v847_v31, %v777_v3  ;;  %v1828_v34 = vpop.f32.mrb[25].mxu1  ;;  %v1842_v35 = vpop.f32.mrb[29].mxu0 }
 0x253   : > { %v850_v36 = vpop.f32.mrb[26].mxu1  ;;  %v942_v37 = vpop.f32.mrb[30].mxu0 }
 0x254   : > { %v870_v38 = vadd.f32 %v850_v36, %v778_v5  ;;  %v961_v39 = vadd.f32 %v939_v32, %v869_v33  ;;  %v1829_v40 = vpop.f32.mrb[27].mxu1  ;;  %v1843_v41 = vpop.f32.mrb[31].mxu0 }
 0x256   : > { %v962_v42 = vadd.f32 %v942_v37, %v870_v38 }
 0x259   : > { %v855_v43 = vpop.f32.mrb[28].mxu1  ;;  %v947_v44 = vpop.f32.mrb[32].mxu0 }
 0x25a   : > { %v871_v45 = vadd.f32 %v855_v43, %v779_v18  ;;  %v1832_v46 = vpop.f32.mrb[29].mxu1  ;;  %v1846_v47 = vpop.f32.mrb[33].mxu0 }
 0x25b   : > { %v858_v48 = vpop.f32.mrb[30].mxu1  ;;  %v950_v49 = vpop.f32.mrb[34].mxu0 }
 0x25c   : > { %v872_v50 = vadd.f32 %v858_v48, %v780_v21  ;;  %v963_v51 = vadd.f32 %v947_v44, %v871_v45  ;;  %v1833_v52 = vpop.f32.mrb[31].mxu1  ;;  %v1847_v53 = vpop.f32.mrb[35].mxu0 }
 0x25d   : > { %v1347_v53 = vpop.permute.xlu0 %1346 }
 0x25e   : > { %v964_v54 = vadd.f32 %v950_v49, %v872_v50 }
 0x261   : > { %v863_v55 = vpop.f32.mrb[32].mxu1  ;;  %v955_v56 = vpop.f32.mrb[36].mxu0 }
 0x262   : > { %v873_v57 = vadd.f32 %v863_v55, %v781_v28  ;;  %v1836_v58 = vpop.f32.mrb[33].mxu1  ;;  %v1850_v59 = vpop.f32.mrb[37].mxu0 }
 0x263   : > { %v866_v60 = vpop.f32.mrb[34].mxu1  ;;  %v958_v61 = vpop.f32.mrb[38].mxu0 }
 0x264   : > { %v965_v62 = vadd.f32 %v955_v56, %v873_v57  ;;  %v1837_v63 = vpop.f32.mrb[35].mxu1  ;;  %v1851_v1 = vpop.f32.mrb[39].mxu0 }
 0x269   : > { %v1031_v3 = vpop.f32.mrb[36].mxu1  ;;  %v1123_v4 = vpop.f32.mrb[40].mxu0 }
 0x26a   : > { %v1053_v7 = vadd.f32 %v1031_v3, %v961_v39  ;;  %v1856_v5 = vpop.f32.mrb[37].mxu1  ;;  %v1870_v6 = vpop.f32.mrb[41].mxu0 }
 0x26b   : > { %v1034_v9 = vpop.f32.mrb[38].mxu1  ;;  %v1126_v12 = vpop.f32.mrb[42].mxu0 }
 0x26c   : > { %v1054_v13 = vadd.f32 %v1034_v9, %v962_v42  ;;  %v1145_v14 = vadd.f32 %v1123_v4, %v1053_v7  ;;  %v1857_v15 = vpop.f32.mrb[39].mxu1  ;;  %v1871_v16 = vpop.f32.mrb[43].mxu0 }
 0x26d   : > { %v1342_v39 = vpop.permute.xlu1 %1341 }
 0x26e   : > { %v1146_v17 = vadd.f32 %v1126_v12, %v1054_v13 }
 0x271   : > { %v1039_v18 = vpop.f32.mrb[40].mxu1  ;;  %v1131_v19 = vpop.f32.mrb[44].mxu0 }
 0x272   : > { %v1055_v20 = vadd.f32 %v1039_v18, %v963_v51  ;;  %v1860_v21 = vpop.f32.mrb[41].mxu1  ;;  %v1874_v22 = vpop.f32.mrb[45].mxu0 }
 0x273   : > { %v1042_v23 = vpop.f32.mrb[42].mxu1  ;;  %v1134_v24 = vpop.f32.mrb[46].mxu0 }
 0x274   : > { %v1056_v25 = vadd.f32 %v1042_v23, %v964_v54  ;;  %v1147_v26 = vadd.f32 %v1131_v19, %v1055_v20  ;;  %v1861_v27 = vpop.f32.mrb[43].mxu1  ;;  %v1875_v0 = vpop.f32.mrb[47].mxu0 }
 0x275   : > { %v1352_v54 = vpop.permute.xlu1 %1351  ;;  %v1362_v22 = vpop.permute.xlu0 %1361 }
 0x276   : > { %v1148_v28 = vadd.f32 %v1134_v24, %v1056_v25 }
 0x279   : > { %v1047_v29 = vpop.f32.mrb[44].mxu1  ;;  %v1139_v30 = vpop.f32.mrb[48].mxu0 }
 0x27a   : > { %v1057_v31 = vadd.f32 %v1047_v29, %v965_v62  ;;  %v1864_v32 = vpop.f32.mrb[45].mxu1  ;;  %v1878_v33 = vpop.f32.mrb[49].mxu0 }
 0x27b   : > { %v1050_v34 = vpop.f32.mrb[46].mxu1  ;;  %v1142_v35 = vpop.f32.mrb[50].mxu0 }
 0x27c   : > { %v1149_v36 = vadd.f32 %v1139_v30, %v1057_v31  ;;  %v1865_v37 = vpop.f32.mrb[47].mxu1  ;;  %v1879_v38 = vpop.f32.mrb[51].mxu0 }
 0x27d   : > { %v1357_v6 = vpop.permute.xlu1 %1356 }
 0x281   : > { %v1215_v40 = vpop.f32.mrb[48].mxu1  ;;  %v1307_v41 = vpop.f32.mrb[52].mxu0 }
 0x282   : > { %v1237_v42 = vadd.f32 %v1215_v40, %v1145_v14  ;;  %v1884_v43 = vpop.f32.mrb[49].mxu1  ;;  %v1898_v44 = vpop.f32.mrb[53].mxu0 }
 0x283   : > { %v1218_v45 = vpop.f32.mrb[50].mxu1  ;;  %v1310_v46 = vpop.f32.mrb[54].mxu0 }
 0x284   : > { %v1238_v47 = vadd.f32 %v1218_v45, %v1146_v17  ;;  %v1329_v48 = vadd.f32 %v1307_v41, %v1237_v42  ;;  %v1885_v49 = vpop.f32.mrb[51].mxu1  ;;  %v1899_v50 = vpop.f32.mrb[55].mxu0 }
 0x285   : > { %v1387_v24 = vpop.permute.xlu1 %1386 }
 0x286   : > { %v1364_v51 = vadd.f32 %v1342_v39, %v1329_v48  ;;  %v1330_v52 = vadd.f32 %v1310_v46, %v1238_v47  ;;  %vm1388_vm10 = vcmp.ne.s32.totalorder %v1387_v24, 0 }
 0x287   : > { %vm1389_vm11 = vmand %vm327_vm3, %vm1388_vm10 }
 0x288   : > { %v1365_v55 = vadd.f32 %v1347_v53, %v1330_v52  ;;  %1401 = vrot.lane.b32.xlu0 %v1364_v51, %s1983_s14  ;;  %v1390_v25 = vsel %vm1389_vm11, 1, %v1973_v2 }
 0x289   : > { %v1223_v56 = vpop.f32.mrb[52].mxu1  ;;  %v1315_v57 = vpop.f32.mrb[56].mxu0 }
 0x28a   : > { %v1239_v58 = vadd.f32 %v1223_v56, %v1147_v26  ;;  %v1888_v59 = vpop.f32.mrb[53].mxu1  ;;  %1403 = vrot.lane.b32.xlu1 %v1365_v55, %s1983_s14  ;;  %v1902_v60 = vpop.f32.mrb[57].mxu0  ;;  %v1394_v26 = vrot.slane %v1390_v25, %v405_v11 }
 0x28b   : > { %v1226_v61 = vpop.f32.mrb[54].mxu1  ;;  %v1318_v62 = vpop.f32.mrb[58].mxu0 }
 0x28c   : > { %v1240_v63 = vadd.f32 %v1226_v61, %v1148_v28  ;;  %v1331_v1 = vadd.f32 %v1315_v57, %v1239_v58  ;;  %v1889_v3 = vpop.f32.mrb[55].mxu1  ;;  %v1903_v4 = vpop.f32.mrb[59].mxu0  ;;  %vm1395_vm12 = vcmp.eq.s32.totalorder %v1394_v26, 1 }
 0x28e   : > { %v1366_v7 = vadd.f32 %v1352_v54, %v1331_v1  ;;  %v1332_v5 = vadd.f32 %v1318_v62, %v1240_v63 }
 0x290   : > { %v1367_v9 = vadd.f32 %v1357_v6, %v1332_v5  ;;  %1405 = vrot.lane.b32.xlu0 %v1366_v7, %s1983_s14 }
 0x291   : > { %v1231_v12 = vpop.f32.mrb[56].mxu1  ;;  %v1323_v13 = vpop.f32.mrb[60].mxu0 }
 0x292   : > { %v1241_v14 = vadd.f32 %v1231_v12, %v1149_v36  ;;  %1407 = vrot.lane.b32.xlu1 %v1367_v9, %s1983_s14  ;;  %v1892_v15 = vpop.f32.mrb[57].mxu1  ;;  %v1906_v16 = vpop.f32.mrb[61].mxu0 }
 0x293   : > { %v1234_v17 = vpop.f32.mrb[58].mxu1  ;;  %v1326_v18 = vpop.f32.mrb[62].mxu0 }
 0x294   : > { %v1333_v19 = vadd.f32 %v1323_v13, %v1241_v14  ;;  %v1893_v20 = vpop.f32.mrb[59].mxu1  ;;  %v1907_v21 = vpop.f32.mrb[63].mxu0 }
 0x296   : > { %v1368_v23 = vadd.f32 %v1362_v22, %v1333_v19 }
 0x298   : > { %1409 = vrot.lane.b32.xlu0 %v1368_v23, %s1983_s14 }
 0x2fa   : > { %v1402_v27 = vpop.permute.xlu0 %1401 }
 0x2fb   : > { %v1416_v0 = vsel %vm1395_vm12, %v1402_v27, 0.0 }
 0x2fc   : > { %v1404_v28 = vpop.permute.xlu1 %1403  ;;  %1426 = vrot.lane.b32.xlu1 %v1416_v0, %s1977_s30  ;;  %v1463_v31 = vmul.f32 %v1416_v0, %v1416_v0 }
 0x2fd   : > { %v1417_v29 = vsel %vm1395_vm12, %v1404_v28, 0.0 }
 0x2fe   : > { %v1464_v30 = vmul.f32 %v1417_v29, %v1417_v29  ;;  %1428 = vrot.lane.b32.xlu0 %v1417_v29, %s1977_s30 }
 0x300   : > { %1475 = vrot.lane.b32.xlu1 %v1464_v30, %s1977_s30 }
 0x302   : > { %v1406_v8 = vpop.permute.xlu0 %1405  ;;  %1473 = vrot.lane.b32.xlu0 %v1463_v31, %s1977_s30 }
 0x303   : > { %v1418_v2 = vsel %vm1395_vm12, %v1406_v8, 0.0 }
 0x304   : > { %1430 = vrot.lane.b32.xlu1 %v1418_v2, %s1977_s30  ;;  %v1408_v10 = vpop.permute.xlu1 %1407  ;;  %v1465_v32 = vmul.f32 %v1418_v2, %v1418_v2 }
 0x305   : > { %v1419_v11 = vsel %vm1395_vm12, %v1408_v10, 0.0 }
 0x306   : > { %1432 = vrot.lane.b32.xlu0 %v1419_v11, %s1977_s30  ;;  %v1466_v36 = vmul.f32 %v1419_v11, %v1419_v11 }
 0x30a   : > { %1477 = vrot.lane.b32.xlu0 %v1465_v32, %s1977_s30  ;;  %v1410_v33 = vpop.permute.xlu0 %1409 }
 0x30b   : > { %v1420_v34 = vsel %vm1395_vm12, %v1410_v33, 0.0 }
 0x30c   : > { %v1467_v35 = vmul.f32 %v1420_v34, %v1420_v34  ;;  %1434 = vrot.lane.b32.xlu1 %v1420_v34, %s1977_s30 }
 0x30e   : > { %1481 = vrot.lane.b32.xlu0 %v1467_v35, %s1977_s30 }
 0x310   : > { %1479 = vrot.lane.b32.xlu1 %v1466_v36, %s1977_s30 }
 0x36e   : > { %v1427_v37 = vpop.permute.xlu1 %1426 }
 0x36f   : > { %v1442_v38 = vsel %vm1441_vm13, %v1427_v37, 0.0 }
 0x370   : > { %1443 = vadd.xlane.f32.xlu1 %v1442_v38  ;;  %v1429_v39 = vpop.permute.xlu0 %1428 }
 0x371   : > { %v1445_v40 = vsel %vm1441_vm13, %v1429_v39, 0.0 }
 0x372   : > { %v1476_v41 = vpop.permute.xlu1 %1475  ;;  %1446 = vadd.xlane.f32.xlu0 %v1445_v40 }
 0x373   : > { %v1491_v43 = vsel %vm1441_vm13, %v1476_v41, 0.0 }
 0x374   : > { %v1474_v42 = vpop.permute.xlu0 %1473 }
 0x375   : > { %v1488_v44 = vsel %vm1441_vm13, %v1474_v42, 0.0 }
 0x376   : > { %v1431_v45 = vpop.permute.xlu1 %1430  ;;  %1492 = vadd.xlane.f32.xlu0 %v1491_v43  ;;  %1489 = vadd.xlane.f32.xlu1 %v1488_v44 }
 0x377   : > { %v1448_v47 = vsel %vm1441_vm13, %v1431_v45, 0.0 }
 0x378   : > { %v1433_v46 = vpop.permute.xlu0 %1432 }
 0x379   : > { %v1451_v48 = vsel %vm1441_vm13, %v1433_v46, 0.0 }
 0x37a   : > { %1449 = vadd.xlane.f32.xlu0 %v1448_v47  ;;  %1452 = vadd.xlane.f32.xlu1 %v1451_v48 }
 0x37c   : > { %v1478_v49 = vpop.permute.xlu0 %1477 }
 0x37d   : > { %v1494_v50 = vsel %vm1441_vm13, %v1478_v49, 0.0 }
 0x37e   : > { %v1435_v51 = vpop.permute.xlu1 %1434  ;;  %1495 = vadd.xlane.f32.xlu1 %v1494_v50 }
 0x37f   : > { %v1454_v52 = vsel %vm1441_vm13, %v1435_v51, 0.0 }
 0x380   : > { %1455 = vadd.xlane.f32.xlu0 %v1454_v52  ;;  %v1482_v53 = vpop.permute.xlu0 %1481 }
 0x381   : > { %v1500_v54 = vsel %vm1441_vm13, %v1482_v53, 0.0 }
 0x382   : > { %v1480_v55 = vpop.permute.xlu1 %1479  ;;  %1501 = vadd.xlane.f32.xlu1 %v1500_v54 }
 0x383   : > { %v1497_v56 = vsel %vm1441_vm13, %v1480_v55, 0.0 }
 0x384   : > { %1498 = vadd.xlane.f32.xlu0 %v1497_v56 }
 0x3fd   : > { %v1444_v57 = vpop.xlane.xlu1 %1443 }
 0x3fe   : > { %1458 = vst.msk [vmem:[%s310_s15] sm:$0xff] %vm1457_vm14, %v1444_v57 }
 0x3ff   : > { %v1447_v58 = vpop.xlane.xlu0 %1446 }
 0x400   : > { %1459 = vst.msk [vmem:[%s310_s15 + $0x8] sm:$0xff] %vm1457_vm14, %v1447_v58 }
 0x403   : > { %v1490_v59 = vpop.xlane.xlu1 %1489  ;;  %v1493_v60 = vpop.xlane.xlu0 %1492 }
 0x404   : > { %1503 = vst.msk [vmem:[%s315_s18] sm:$0xff] %vm1457_vm14, %v1490_v59  ;;  %1504 = vst.msk [vmem:[%s315_s18 + $0x8] sm:$0xff] %vm1457_vm14, %v1493_v60 }
 0x407   : > { %v1453_v61 = vpop.xlane.xlu1 %1452  ;;  %v1450_v62 = vpop.xlane.xlu0 %1449 }
 0x408   : > { %1461 = vst.msk [vmem:[%s310_s15 + $0x18] sm:$0xff] %vm1457_vm14, %v1453_v61  ;;  %1460 = vst.msk [vmem:[%s310_s15 + $0x10] sm:$0xff] %vm1457_vm14, %v1450_v62 }
 0x40b   : > { %v1496_v63 = vpop.xlane.xlu1 %1495 }
 0x40c   : > { %1505 = vst.msk [vmem:[%s315_s18 + $0x10] sm:$0xff] %vm1457_vm14, %v1496_v63 }
 0x40d   : > { %v1456_v1 = vpop.xlane.xlu0 %1455 }
 0x40e   : > { %1462 = vst.msk [vmem:[%s310_s15 + $0x20] sm:$0xff] %vm1457_vm14, %v1456_v1 }
 0x40f   : > { %v1502_v3 = vpop.xlane.xlu1 %1501 }
 0x410   : > { %1507 = vst.msk [vmem:[%s315_s18 + $0x20] sm:$0xff] %vm1457_vm14, %v1502_v3 }
 0x411   : > { %v1499_v4 = vpop.xlane.xlu0 %1498 }
 0x412   : > { %1506 = vst.msk [vmem:[%s315_s18 + $0x18] sm:$0xff] %vm1457_vm14, %v1499_v4 }
 0x413 PF: > { %s19_s27 = sadd.s32 1, %s1969_s27  }
 0x414   : > { %p16_p6 = scmp.ge.s32.totalorder %s19_s27, 4  }
 0x416   :  { %18 = sbr.rel (!%p16_p6) target bundleno = 1 (0x1), region = 98 }

</bundles_post_ra>
